<compile_context>
chip_gen: v7x
topology: tpu7x:2x2x1
jax: 0.10.0
libtpu: 0.0.40
codegen_flags: <defaults>
</compile_context>

<pallas_src>
import functools
import numpy as np
import jax
import jax.numpy as jnp
from jax.experimental import pallas as pl
from jax.experimental.pallas import tpu as pltpu

EPS = 1e-6


# ----------------------------------------------------------------------------
# Fused bidirectional GRIL kernel: grid = (direction, time)
# ----------------------------------------------------------------------------
def _fused_bigril_kernel(
    # per-step sequences (blocks: (channels, B*N))
    xp_ref, mp_ref, xc_ref, mc_ref, u_ref, v_ref,
    # diffusion operators, (order*support_len, BN, BN), VMEM-resident
    M_ref,
    # weights (direction block selected by BlockSpec index_map)
    Win_ref, bin_ref, Wru_ref, bru_ref, Wcand_ref, bcand_ref,
    Wfs_ref, bfs_ref, Wgc_ref, bgc_ref, Wlin_ref, blin_ref,
    Wro_ref, bro_ref,
    # PReLU alphas (one per direction) in SMEM
    alpha_ref,
    # per-step outputs
    imp_ref, pred_ref, repr_ref,
    # recurrent state, persists across the time grid axis
    h_scr, x2_scr,
    *, C, H, L, order, sl):
    d = pl.program_id(0)     # direction (parallel)
    t = pl.program_id(1)     # time step (arbitrary / sequential)
    n_diff = order * sl

    @pl.when(t == 0)
    def _init():
        h_scr[...] = jnp.zeros_like(h_scr)
        x2_scr[...] = jnp.zeros_like(x2_scr)

    # per-step inputs
    xp = xp_ref[...]   # previous-step observation (zeros at t==0)
    mp = mp_ref[...]   # previous-step mask        (zeros at t==0)
    xc = xc_ref[...]   # current-step observation
    mc = mc_ref[...]   # current-step mask
    uc = u_ref[...]    # exogenous, hidden-sized
    vc = v_ref[...]    # exogenous, d_in-sized (shared by both directions)

    def mm(a, b):
        return jnp.dot(a, b, preferred_element_type=jnp.float32)

    def gconv(blocks, w, b):
        # W @ concat(blocks, axis=0) + b  via split-weight accumulation
        cin = blocks[0].shape[0]
        acc = b
        for k, blk in enumerate(blocks):
            acc = acc + mm(w[:, k * cin:(k + 1) * cin], blk)
        return acc

    win = Win_ref[...]
    bin_ = bin_ref[...]

    def input_proj(xs, ms):
        # input_projection(cat([x, m, v])) + u, split weights -> no concat
        return (mm(win[:, 0:C], xs) + mm(win[:, C:2 * C], ms)
                + mm(win[:, 2 * C:3 * C], vc) + bin_ + uc)

    # ---- stage 1: previous-step data imputed with the carried xs_hat_2
    x_s1 = jnp.where(mp > 0, xp, x2_scr[...])
    rnn_in = input_proj(x_s1, mp)

    # ---- GCGRU recurrent layers (state stays in VMEM scratch)
    for l in range(L):
        h_prev = h_scr[l]
        xg = jnp.concatenate([rnn_in, h_prev], axis=0)                # (2H, BN)
        # diffusions of x_gates computed ONCE, shared by r and u gates
        g_blocks = [xg] + [mm(xg, M_ref[k]) for k in range(n_diff)]
        ru = gconv(g_blocks, Wru_ref[l], bru_ref[l])                  # (2H, BN)
        r = jax.nn.sigmoid(ru[:H])
        ug = jax.nn.sigmoid(ru[H:])
        xcg = jnp.concatenate([rnn_in, r * h_prev], axis=0)
        c_blocks = [xcg] + [mm(xcg, M_ref[k]) for k in range(n_diff)]
        c = jnp.tanh(gconv(c_blocks, Wcand_ref[l], bcand_ref[l]))
        h_new = ug * h_prev + (1.0 - ug) * c                          # GRU combine
        h_scr[l] = h_new
        rnn_in = h_new
    h_s = rnn_in

    # ---- first-stage prediction
    xs_hat1 = mm(Wfs_ref[...], h_s) + bfs_ref[...]                    # (C, BN)

    # ---- stage 2: current-step data imputed with xs_hat_1
    x_s2 = jnp.where(mc > 0, xc, xs_hat1)
    dec_in = input_proj(x_s2, mc)

    # ---- spatial decoder (graph conv, include_self=False, order=1)
    x_in = jnp.concatenate([dec_in, h_s], axis=0)                     # (2H, BN)
    wgc = Wgc_ref[...]
    gc = bgc_ref[...]
    for k in range(sl):
        gc = gc + mm(wgc[:, k * 2 * H:(k + 1) * 2 * H], mm(x_in, M_ref[k * order]))
    wlin = Wlin_ref[...]
    lin = mm(wlin[:, :H], gc) + mm(wlin[:, H:], h_s) + blin_ref[...]
    alpha = alpha_ref[d]
    act = jnp.where(lin >= 0.0, lin, alpha * lin)                     # PReLU
    wro = Wro_ref[...]
    xs_hat2 = mm(wro[:, :H], act) + mm(wro[:, H:], h_s) + bro_ref[...]

    # ---- carry + per-step outputs
    x2_scr[...] = xs_hat2
    imp_ref[...] = xs_hat2
    pred_ref[...] = xs_hat1
    repr_ref[...] = jnp.concatenate([act, h_s], axis=0)               # (2H, BN)


# ----------------------------------------------------------------------------
# Merge MLP + impute_only_holes masking (single lane-dense kernel)
# ----------------------------------------------------------------------------
def _merge_kernel(fr_ref, br_ref, x_ref, m_ref, W1_ref, b1_ref, W2_ref, b2_ref,
                  o_ref, *, H):
    w1 = W1_ref[...]
    hid = (jnp.dot(w1[:, :2 * H], fr_ref[...], preferred_element_type=jnp.float32)
           + jnp.dot(w1[:, 2 * H:], br_ref[...], preferred_element_type=jnp.float32)
           + b1_ref[...])
    hid = jnp.maximum(hid, 0.0)                                       # ReLU
    out = jnp.dot(W2_ref[...], hid, preferred_element_type=jnp.float32) + b2_ref[...]
    # eval mode + impute_only_holes=True
    o_ref[...] = jnp.where(m_ref[...] > 0, x_ref[...], out)


# ----------------------------------------------------------------------------
# Forward pass wrapper (layout plumbing in plain JAX, compute in 2 kernels)
# ----------------------------------------------------------------------------
def grin_net_forward(params, cfg, x, mask, u, v, edge_index, edge_weight):
    """x/mask/v: (B, S, N, d_in); u: (B, S, N, hidden). Returns torch-layout outputs."""
    B, S, N, C = x.shape
    H = cfg["hidden"]
    L = cfg["n_layers"]
    order = cfg["order"]
    sl = cfg["support_len"]
    BN = B * N

    # 'b s n c -> b c n s'
    to_bcns = lambda t: jnp.transpose(t, (0, 3, 2, 1)).astype(jnp.float32)
    xb, mb, ub, vb = map(to_bcns, (x, mask, u, v))

    # adjacency + normalized supports: tiny constants, computed once in plain JAX
    num_nodes = int(np.max(edge_index)) + 1
    adj = jnp.zeros((num_nodes, num_nodes), jnp.float32).at[
        jnp.asarray(edge_index[0]), jnp.asarray(edge_index[1])].set(
        jnp.asarray(edge_weight, jnp.float32))
    adj_fwd = adj / (adj.sum(1, keepdims=True) + EPS)
    adj_bwd = adj.T / (adj.T.sum(1, keepdims=True) + EPS)

    # right-multiplication diffusion operators on (channels, B*N) slabs:
    #   einsum('bcv,wv->bcw', X, A)  ==  X_flat @ kron(I_B, A.T)
    eyeB = jnp.eye(B, dtype=jnp.float32)
    Ms = []
    for a in (adj_fwd, adj_bwd):
        m1 = jnp.kron(eyeB, a.T)
        mk = m1
        Ms.append(mk)
        for _ in range(order - 1):
            mk = mk @ m1
            Ms.append(mk)
    M_ops = jnp.stack(Ms)                                # (order*sl, BN, BN)

    # (B, Ch, N, S) -> time-major (S, Ch, B*N) slabs
    def to_seq(t):
        Ch = t.shape[1]
        return jnp.transpose(t, (3, 1, 0, 2)).reshape(S, Ch, BN)

    x0, m0, u0, v0 = map(to_seq, (xb, mb, ub, vb))
    flip = lambda t: jnp.flip(t, axis=0)
    x_seq = jnp.stack([x0, flip(x0)])                    # (2, S, C, BN)
    m_seq = jnp.stack([m0, flip(m0)])
    u_seq = jnp.stack([u0, flip(u0)])
    # NOTE: v is NOT time-reversed for the backward direction (matches torch).
    shift = lambda t: jnp.concatenate([jnp.zeros_like(t[:, :1]), t[:, :-1]], axis=1)
    xp_seq = shift(x_seq)
    mp_seq = shift(m_seq)

    pg = params["gril"]
    weight_names = ["Win", "b_in", "Wru", "bru", "Wc", "bc", "Wfs", "bfs",
                    "Wgc", "bgc", "Wlin", "blin", "Wro", "bro"]
    weights = [pg[n] for n in weight_names]

    def seq_spec(ch):
        return pl.BlockSpec((None, None, ch, BN), lambda d, t: (d, t, 0, 0))

    def w_spec(arr):
        nd = arr.ndim - 1
        idx = lambda d, t: (d,) + (0,) * nd              # constant per direction
        return pl.BlockSpec((None,) + tuple(arr.shape[1:]), idx)

    in_specs = (
        [seq_spec(C)] * 4 + [seq_spec(H)]
        + [pl.BlockSpec((None, C, BN), lambda d, t: (t, 0, 0))]      # shared v
        + [pl.BlockSpec(tuple(M_ops.shape), lambda d, t: (0, 0, 0))]  # supports
        + [w_spec(w) for w in weights]
        + [pl.BlockSpec(memory_space=pltpu.MemorySpace.SMEM)]        # PReLU alpha
    )
    out_specs = (seq_spec(C), seq_spec(C), seq_spec(2 * H))
    out_shape = (jax.ShapeDtypeStruct((2, S, C, BN), jnp.float32),
                 jax.ShapeDtypeStruct((2, S, C, BN), jnp.float32),
                 jax.ShapeDtypeStruct((2, S, 2 * H, BN), jnp.float32))

    kern = functools.partial(_fused_bigril_kernel, C=C, H=H, L=L, order=order, sl=sl)
    imp_seq, pred_seq, repr_seq = pl.pallas_call(
        kern,
        grid=(2, S),
        in_specs=in_specs,
        out_specs=out_specs,
        out_shape=out_shape,
        scratch_shapes=[pltpu.VMEM((L, H, BN), jnp.float32),   # recurrent h
                        pltpu.VMEM((C, BN), jnp.float32)],     # carried xs_hat_2
        compiler_params=pltpu.CompilerParams(
            dimension_semantics=("parallel", "arbitrary")),
    )(xp_seq, mp_seq, x_seq, m_seq, u_seq, v0, M_ops, *weights, pg["alpha"])

    def seq_to_bcns(seq):   # (S, Ch, B*N) -> (B, Ch, N, S)
        Ch = seq.shape[1]
        return jnp.transpose(seq.reshape(S, Ch, B, N), (2, 1, 3, 0))

    fwd_out = seq_to_bcns(imp_seq[0])
    fwd_pred = seq_to_bcns(pred_seq[0])
    fwd_repr = seq_to_bcns(repr_seq[0])
    bwd_out = seq_to_bcns(flip(imp_seq[1]))
    bwd_pred = seq_to_bcns(flip(pred_seq[1]))
    bwd_repr = seq_to_bcns(flip(repr_seq[1]))

    repr_ = jnp.concatenate([fwd_repr, bwd_repr], axis=1)            # (B, 4H, N, S)

    # merge='mlp' + impute_only_holes masking, lane-dense (channels, B*N*S)
    P = B * N * S
    FF = params["W_out1"].shape[0]
    to_cp = lambda t: jnp.transpose(t, (1, 0, 2, 3)).reshape(t.shape[1], P)
    full = lambda shp: pl.BlockSpec(shp, lambda i: (0,) * len(shp))
    imp_flat = pl.pallas_call(
        functools.partial(_merge_kernel, H=H),
        grid=(1,),
        in_specs=[full((2 * H, P)), full((2 * H, P)), full((C, P)), full((C, P)),
                  full((FF, 4 * H)), full((FF, 1)), full((C, FF)), full((C, 1))],
        out_specs=full((C, P)),
        out_shape=jax.ShapeDtypeStruct((C, P), jnp.float32),
    )(to_cp(fwd_repr), to_cp(bwd_repr), to_cp(xb), to_cp(mb),
      params["W_out1"], params["b_out1"], params["W_out2"], params["b_out2"])
    imputation = jnp.transpose(imp_flat.reshape(C, B, N, S), (1, 0, 2, 3))

    predictions = jnp.stack([fwd_out, bwd_out, fwd_pred, bwd_pred], axis=0)

    swap = lambda t: jnp.swapaxes(t, -3, -1)
    return swap(imputation), swap(predictions), swap(repr_)


# ----------------------------------------------------------------------------
# Deterministic parameter initialization (shapes follow the PyTorch __init__),
# direction-stacked so both GRIL directions are fed by a single fused kernel.
# ----------------------------------------------------------------------------
def init_params(key, cfg):
    C, H, FF = cfg["d_in"], cfg["hidden"], cfg["ff"]
    L, order, sl = cfg["n_layers"], cfg["order"], cfg["support_len"]
    n_diff = order * sl + 1          # include_self=True
    keys = iter(jax.random.split(key, 512))

    def lin(co, ci, scale=0.1):
        W = scale * jax.random.normal(next(keys), (co, ci), jnp.float32)
        b = 0.01 * jax.random.normal(next(keys), (co, 1), jnp.float32)
        return W, b

    def gril_dir():
        Wru_l, bru_l, Wc_l, bc_l = [], [], [], []
        for _ in range(L):
            cin = n_diff * 2 * H                 # (order*sl+1) * (d_in_cell + H)
            Wr, br = lin(H, cin)                 # forget gate
            Wu, bu = lin(H, cin)                 # update gate
            Wc, bc = lin(H, cin)                 # candidate gate
            Wru_l.append(jnp.concatenate([Wr, Wu], axis=0))   # stacked r/u matmul
            bru_l.append(jnp.concatenate([br, bu], axis=0))
            Wc_l.append(Wc)
            bc_l.append(bc)
        Win, b_in = lin(H, 3 * C)                # input_projection (d_v treated as 0)
        Wfs, bfs = lin(C, H)                     # first_stage
        Wgc, bgc = lin(H, sl * 2 * H)            # decoder graph_conv (order=1, no self)
        Wlin, blin = lin(H, 2 * H)               # decoder lin_out
        Wro, bro = lin(C, 2 * H)                 # decoder read_out
        return dict(Win=Win, b_in=b_in,
                    Wru=jnp.stack(Wru_l), bru=jnp.stack(bru_l),
                    Wc=jnp.stack(Wc_l), bc=jnp.stack(bc_l),
                    Wfs=Wfs, bfs=bfs, Wgc=Wgc, bgc=bgc,
                    Wlin=Wlin, blin=blin, Wro=Wro, bro=bro,
                    alpha=jnp.array(0.25, jnp.float32))       # PReLU default
    d0, d1 = gril_dir(), gril_dir()
    gril = {k: jnp.stack([d0[k], d1[k]]) for k in d0}

    W1, b1 = lin(FF, 4 * H)                      # BiGRIL merge MLP
    W2, b2 = lin(C, FF)
    return dict(gril=gril, W_out1=W1, b_out1=b1, W_out2=W2, b_out2=b2)


# ----------------------------------------------------------------------------
if __name__ == "__main__":
    key = jax.random.PRNGKey(0)
    k_x, k_m, k_u, k_v, k_p = jax.random.split(key, 5)

    B, S, N, D_IN, HIDDEN, FF = 2, 4, 8, 2, 16, 32
    cfg = dict(d_in=D_IN, hidden=HIDDEN, ff=FF, n_layers=1, order=2, support_len=2)

    x = jax.random.normal(k_x, (B, S, N, D_IN), jnp.float32)
    mask = (jax.random.uniform(k_m, (B, S, N, D_IN)) > 0.3).astype(jnp.float32)
    # u is added to the hidden-size projected inputs inside GRIL -> hidden channels
    u = 0.1 * jax.random.normal(k_u, (B, S, N, HIDDEN), jnp.float32)
    # v supplies the third d_in-channel block expected by input_projection (3*d_in)
    v = 0.1 * jax.random.normal(k_v, (B, S, N, D_IN), jnp.float32)

    # bidirectional ring graph
    src = np.arange(N)
    dst = (src + 1) % N
    edge_index = np.stack([np.concatenate([src, dst]),
                           np.concatenate([dst, src])]).astype(np.int32)
    edge_weight = np.ones(edge_index.shape[1], np.float32)

    params = init_params(k_p, cfg)

    @jax.jit
    def run(x, mask, u, v):
        return grin_net_forward(params, cfg, x, mask, u, v, edge_index, edge_weight)

    imputation, prediction, repr_ = run(x, mask, u, v)
    jax.block_until_ready((imputation, prediction, repr_))

    assert imputation.shape == (B, S, N, D_IN)
    assert prediction.shape == (4, B, S, N, D_IN)
    assert repr_.shape == (B, S, N, 4 * HIDDEN)
    assert bool(jnp.all(jnp.isfinite(imputation)))
    assert bool(jnp.all(jnp.isfinite(prediction)))
    assert bool(jnp.all(jnp.isfinite(repr_)))
    print("KERNEL_OK")
</pallas_src>

<mosaic_0001>
module attributes {stable_mosaic.version = 11 : i64} {
  func.func @_fused_bigril_kernel(%arg0: i32, %arg1: i32, %arg2: memref<1x1x2x16xf32, #tpu.memory_space<vmem>>, %arg3: memref<1x1x2x16xf32, #tpu.memory_space<vmem>>, %arg4: memref<1x1x2x16xf32, #tpu.memory_space<vmem>>, %arg5: memref<1x1x2x16xf32, #tpu.memory_space<vmem>>, %arg6: memref<1x1x16x16xf32, #tpu.memory_space<vmem>>, %arg7: memref<1x2x16xf32, #tpu.memory_space<vmem>>, %arg8: memref<4x16x16xf32, #tpu.memory_space<vmem>>, %arg9: memref<1x16x6xf32, #tpu.memory_space<vmem>>, %arg10: memref<1x16x1xf32, #tpu.memory_space<vmem>>, %arg11: memref<1x1x32x160xf32, #tpu.memory_space<vmem>>, %arg12: memref<1x1x32x1xf32, #tpu.memory_space<vmem>>, %arg13: memref<1x1x16x160xf32, #tpu.memory_space<vmem>>, %arg14: memref<1x1x16x1xf32, #tpu.memory_space<vmem>>, %arg15: memref<1x2x16xf32, #tpu.memory_space<vmem>>, %arg16: memref<1x2x1xf32, #tpu.memory_space<vmem>>, %arg17: memref<1x16x64xf32, #tpu.memory_space<vmem>>, %arg18: memref<1x16x1xf32, #tpu.memory_space<vmem>>, %arg19: memref<1x16x32xf32, #tpu.memory_space<vmem>>, %arg20: memref<1x16x1xf32, #tpu.memory_space<vmem>>, %arg21: memref<1x2x32xf32, #tpu.memory_space<vmem>>, %arg22: memref<1x2x1xf32, #tpu.memory_space<vmem>>, %arg23: memref<2xf32, #tpu.memory_space<smem>>, %arg24: memref<1x1x2x16xf32, #tpu.memory_space<vmem>>, %arg25: memref<1x1x2x16xf32, #tpu.memory_space<vmem>>, %arg26: memref<1x1x32x16xf32, #tpu.memory_space<vmem>>, %arg27: memref<1x16x16xf32, #tpu.memory_space<vmem>>, %arg28: memref<2x16xf32, #tpu.memory_space<vmem>>) attributes {dimension_semantics = [#tpu.dimension_semantics<parallel>, #tpu.dimension_semantics<arbitrary>], iteration_bounds = array<i64: 2, 4>, scalar_prefetch = 0 : i64, scratch_operands = 2 : i64, tpu.core_type = #tpu.core_type<tc>, window_params = [{transform_indices = @transform_0, window_bounds = array<i64: 1, 1, 2, 16>}, {transform_indices = @transform_1, window_bounds = array<i64: 1, 1, 2, 16>}, {transform_indices = @transform_2, window_bounds = array<i64: 1, 1, 2, 16>}, {transform_indices = @transform_3, window_bounds = array<i64: 1, 1, 2, 16>}, {transform_indices = @transform_4, window_bounds = array<i64: 1, 1, 16, 16>}, {transform_indices = @transform_5, window_bounds = array<i64: 1, 2, 16>}, {pipeline_mode = #tpu.pipeline_mode<synchronous>, transform_indices = @transform_6, window_bounds = array<i64: 4, 16, 16>}, {transform_indices = @transform_7, window_bounds = array<i64: 1, 16, 6>}, {transform_indices = @transform_8, window_bounds = array<i64: 1, 16, 1>}, {transform_indices = @transform_9, window_bounds = array<i64: 1, 1, 32, 160>}, {transform_indices = @transform_10, window_bounds = array<i64: 1, 1, 32, 1>}, {transform_indices = @transform_11, window_bounds = array<i64: 1, 1, 16, 160>}, {transform_indices = @transform_12, window_bounds = array<i64: 1, 1, 16, 1>}, {transform_indices = @transform_13, window_bounds = array<i64: 1, 2, 16>}, {transform_indices = @transform_14, window_bounds = array<i64: 1, 2, 1>}, {transform_indices = @transform_15, window_bounds = array<i64: 1, 16, 64>}, {transform_indices = @transform_16, window_bounds = array<i64: 1, 16, 1>}, {transform_indices = @transform_17, window_bounds = array<i64: 1, 16, 32>}, {transform_indices = @transform_18, window_bounds = array<i64: 1, 16, 1>}, {transform_indices = @transform_19, window_bounds = array<i64: 1, 2, 32>}, {transform_indices = @transform_20, window_bounds = array<i64: 1, 2, 1>}, {transform_indices = @transform_21, window_bounds = array<i64: 2>}, {transform_indices = @transform_22, window_bounds = array<i64: 1, 1, 2, 16>}, {transform_indices = @transform_23, window_bounds = array<i64: 1, 1, 2, 16>}, {transform_indices = @transform_24, window_bounds = array<i64: 1, 1, 32, 16>}]} {
    %c0_i32 = arith.constant 0 : i32
    %0 = arith.cmpi eq, %arg1, %c0_i32 : i32
    %1 = arith.extui %0 : i1 to i32
    %c0_i32_0 = arith.constant 0 : i32
    %2 = arith.cmpi ne, %1, %c0_i32_0 : i32
    scf.if %2 {
      %cst_156 = arith.constant 0.000000e+00 : f32
      %203 = vector.broadcast %cst_156 : f32 to vector<1x16x16xf32>
      %c0_157 = arith.constant 0 : index
      %c0_158 = arith.constant 0 : index
      %c0_159 = arith.constant 0 : index
      %204 = vector.load %arg27[%c0_157, %c0_158, %c0_159] : memref<1x16x16xf32, #tpu.memory_space<vmem>>, vector<1x16x16xf32>
      tpu.vector_store %arg27[%c0_157, %c0_158, %c0_159], %203 {strides = array<i32>} : memref<1x16x16xf32, #tpu.memory_space<vmem>>, vector<1x16x16xf32>,
      %cst_160 = arith.constant 0.000000e+00 : f32
      %205 = vector.broadcast %cst_160 : f32 to vector<2x16xf32>
      %c0_161 = arith.constant 0 : index
      %c0_162 = arith.constant 0 : index
      %206 = vector.load %arg28[%c0_161, %c0_162] : memref<2x16xf32, #tpu.memory_space<vmem>>, vector<2x16xf32>
      tpu.vector_store %arg28[%c0_161, %c0_162], %205 {strides = array<i32>} : memref<2x16xf32, #tpu.memory_space<vmem>>, vector<2x16xf32>,
    } else {
    }
    %c0 = arith.constant 0 : index
    %c0_1 = arith.constant 0 : index
    %c0_2 = arith.constant 0 : index
    %c0_3 = arith.constant 0 : index
    %3 = vector.load %arg2[%c0, %c0_1, %c0_2, %c0_3] : memref<1x1x2x16xf32, #tpu.memory_space<vmem>>, vector<1x1x2x16xf32>
    %4 = vector.shape_cast %3 : vector<1x1x2x16xf32> to vector<2x16xf32>
    %c0_4 = arith.constant 0 : index
    %c0_5 = arith.constant 0 : index
    %c0_6 = arith.constant 0 : index
    %c0_7 = arith.constant 0 : index
    %5 = vector.load %arg3[%c0_4, %c0_5, %c0_6, %c0_7] : memref<1x1x2x16xf32, #tpu.memory_space<vmem>>, vector<1x1x2x16xf32>
    %6 = vector.shape_cast %5 : vector<1x1x2x16xf32> to vector<2x16xf32>
    %c0_8 = arith.constant 0 : index
    %c0_9 = arith.constant 0 : index
    %c0_10 = arith.constant 0 : index
    %c0_11 = arith.constant 0 : index
    %7 = vector.load %arg4[%c0_8, %c0_9, %c0_10, %c0_11] : memref<1x1x2x16xf32, #tpu.memory_space<vmem>>, vector<1x1x2x16xf32>
    %8 = vector.shape_cast %7 : vector<1x1x2x16xf32> to vector<2x16xf32>
    %c0_12 = arith.constant 0 : index
    %c0_13 = arith.constant 0 : index
    %c0_14 = arith.constant 0 : index
    %c0_15 = arith.constant 0 : index
    %9 = vector.load %arg5[%c0_12, %c0_13, %c0_14, %c0_15] : memref<1x1x2x16xf32, #tpu.memory_space<vmem>>, vector<1x1x2x16xf32>
    %10 = vector.shape_cast %9 : vector<1x1x2x16xf32> to vector<2x16xf32>
    %c0_16 = arith.constant 0 : index
    %c0_17 = arith.constant 0 : index
    %c0_18 = arith.constant 0 : index
    %c0_19 = arith.constant 0 : index
    %11 = vector.load %arg6[%c0_16, %c0_17, %c0_18, %c0_19] : memref<1x1x16x16xf32, #tpu.memory_space<vmem>>, vector<1x1x16x16xf32>
    %12 = vector.shape_cast %11 : vector<1x1x16x16xf32> to vector<16x16xf32>
    %c0_20 = arith.constant 0 : index
    %c0_21 = arith.constant 0 : index
    %c0_22 = arith.constant 0 : index
    %13 = vector.load %arg7[%c0_20, %c0_21, %c0_22] : memref<1x2x16xf32, #tpu.memory_space<vmem>>, vector<1x2x16xf32>
    %14 = vector.shape_cast %13 : vector<1x2x16xf32> to vector<2x16xf32>
    %c0_23 = arith.constant 0 : index
    %c0_24 = arith.constant 0 : index
    %c0_25 = arith.constant 0 : index
    %15 = vector.load %arg9[%c0_23, %c0_24, %c0_25] : memref<1x16x6xf32, #tpu.memory_space<vmem>>, vector<1x16x6xf32>
    %16 = vector.shape_cast %15 : vector<1x16x6xf32> to vector<16x6xf32>
    %c0_26 = arith.constant 0 : index
    %c0_27 = arith.constant 0 : index
    %c0_28 = arith.constant 0 : index
    %17 = vector.load %arg10[%c0_26, %c0_27, %c0_28] : memref<1x16x1xf32, #tpu.memory_space<vmem>>, vector<1x16x1xf32>
    %18 = vector.shape_cast %17 : vector<1x16x1xf32> to vector<16x1xf32>
    %cst = arith.constant 0.000000e+00 : f32
    %19 = vector.broadcast %cst : f32 to vector<2x16xf32>
    %20 = arith.cmpf ogt, %6, %19 : vector<2x16xf32>
    %c0_29 = arith.constant 0 : index
    %c0_30 = arith.constant 0 : index
    %21 = vector.load %arg28[%c0_29, %c0_30] : memref<2x16xf32, #tpu.memory_space<vmem>>, vector<2x16xf32>
    %22 = arith.select %20, %4, %21 : vector<2x16xi1>, vector<2x16xf32>
    %23 = vector.extract_strided_slice %16 {offsets = [0, 0], sizes = [16, 2], strides = [1, 1]} : vector<16x6xf32> to vector<16x2xf32>
    %cst_31 = arith.constant dense<0.000000e+00> : vector<16x16xf32>
    %24 = tpu.matmul %23, %22, %cst_31 {dimension_numbers = #tpu.dot_dimension_numbers<[1], [0], [0], [1], [0, 0, 1, 1], [], []>} : vector<16x2xf32>, vector<2x16xf32>, vector<16x16xf32> -> vector<16x16xf32>
    %25 = vector.extract_strided_slice %16 {offsets = [0, 2], sizes = [16, 2], strides = [1, 1]} : vector<16x6xf32> to vector<16x2xf32>
    %cst_32 = arith.constant dense<0.000000e+00> : vector<16x16xf32>
    %26 = tpu.matmul %25, %6, %cst_32 {dimension_numbers = #tpu.dot_dimension_numbers<[1], [0], [0], [1], [0, 0, 1, 1], [], []>} : vector<16x2xf32>, vector<2x16xf32>, vector<16x16xf32> -> vector<16x16xf32>
    %27 = arith.addf %24, %26 : vector<16x16xf32>
    %28 = vector.extract_strided_slice %16 {offsets = [0, 4], sizes = [16, 2], strides = [1, 1]} : vector<16x6xf32> to vector<16x2xf32>
    %cst_33 = arith.constant dense<0.000000e+00> : vector<16x16xf32>
    %29 = tpu.matmul %28, %14, %cst_33 {dimension_numbers = #tpu.dot_dimension_numbers<[1], [0], [0], [1], [0, 0, 1, 1], [], []>} : vector<16x2xf32>, vector<2x16xf32>, vector<16x16xf32> -> vector<16x16xf32>
    %30 = arith.addf %27, %29 : vector<16x16xf32>
    %31 = vector.broadcast %18 : vector<16x1xf32> to vector<16x16xf32>
    %32 = arith.addf %30, %31 : vector<16x16xf32>
    %33 = arith.addf %32, %12 : vector<16x16xf32>
    %c0_34 = arith.constant 0 : index
    %c0_35 = arith.constant 0 : index
    %c0_36 = arith.constant 0 : index
    %34 = vector.load %arg27[%c0_34, %c0_35, %c0_36] : memref<1x16x16xf32, #tpu.memory_space<vmem>>, vector<1x16x16xf32>
    %35 = vector.shape_cast %34 : vector<1x16x16xf32> to vector<16x16xf32>
    %36 = tpu.concatenate %33, %35 in 0 : vector<16x16xf32>, vector<16x16xf32> -> vector<32x16xf32>
    %c0_37 = arith.constant 0 : index
    %c0_38 = arith.constant 0 : index
    %c0_39 = arith.constant 0 : index
    %37 = vector.load %arg8[%c0_37, %c0_38, %c0_39] : memref<4x16x16xf32, #tpu.memory_space<vmem>>, vector<1x16x16xf32>
    %38 = vector.shape_cast %37 : vector<1x16x16xf32> to vector<16x16xf32>
    %cst_40 = arith.constant dense<0.000000e+00> : vector<32x16xf32>
    %39 = tpu.matmul %36, %38, %cst_40 {dimension_numbers = #tpu.dot_dimension_numbers<[1], [0], [0], [1], [0, 0, 1, 1], [], []>} : vector<32x16xf32>, vector<16x16xf32>, vector<32x16xf32> -> vector<32x16xf32>
    %c1 = arith.constant 1 : index
    %c0_41 = arith.constant 0 : index
    %c0_42 = arith.constant 0 : index
    %40 = vector.load %arg8[%c1, %c0_41, %c0_42] : memref<4x16x16xf32, #tpu.memory_space<vmem>>, vector<1x16x16xf32>
    %41 = vector.shape_cast %40 : vector<1x16x16xf32> to vector<16x16xf32>
    %cst_43 = arith.constant dense<0.000000e+00> : vector<32x16xf32>
    %42 = tpu.matmul %36, %41, %cst_43 {dimension_numbers = #tpu.dot_dimension_numbers<[1], [0], [0], [1], [0, 0, 1, 1], [], []>} : vector<32x16xf32>, vector<16x16xf32>, vector<32x16xf32> -> vector<32x16xf32>
    %c2 = arith.constant 2 : index
    %c0_44 = arith.constant 0 : index
    %c0_45 = arith.constant 0 : index
    %43 = vector.load %arg8[%c2, %c0_44, %c0_45] : memref<4x16x16xf32, #tpu.memory_space<vmem>>, vector<1x16x16xf32>
    %44 = vector.shape_cast %43 : vector<1x16x16xf32> to vector<16x16xf32>
    %cst_46 = arith.constant dense<0.000000e+00> : vector<32x16xf32>
    %45 = tpu.matmul %36, %44, %cst_46 {dimension_numbers = #tpu.dot_dimension_numbers<[1], [0], [0], [1], [0, 0, 1, 1], [], []>} : vector<32x16xf32>, vector<16x16xf32>, vector<32x16xf32> -> vector<32x16xf32>
    %c3 = arith.constant 3 : index
    %c0_47 = arith.constant 0 : index
    %c0_48 = arith.constant 0 : index
    %46 = vector.load %arg8[%c3, %c0_47, %c0_48] : memref<4x16x16xf32, #tpu.memory_space<vmem>>, vector<1x16x16xf32>
    %47 = vector.shape_cast %46 : vector<1x16x16xf32> to vector<16x16xf32>
    %cst_49 = arith.constant dense<0.000000e+00> : vector<32x16xf32>
    %48 = tpu.matmul %36, %47, %cst_49 {dimension_numbers = #tpu.dot_dimension_numbers<[1], [0], [0], [1], [0, 0, 1, 1], [], []>} : vector<32x16xf32>, vector<16x16xf32>, vector<32x16xf32> -> vector<32x16xf32>
    %c0_50 = arith.constant 0 : index
    %c0_51 = arith.constant 0 : index
    %c0_52 = arith.constant 0 : index
    %c0_53 = arith.constant 0 : index
    %49 = vector.load %arg11[%c0_50, %c0_51, %c0_52, %c0_53] : memref<1x1x32x160xf32, #tpu.memory_space<vmem>>, vector<1x1x32x160xf32>
    %50 = vector.shape_cast %49 : vector<1x1x32x160xf32> to vector<32x160xf32>
    %c0_54 = arith.constant 0 : index
    %c0_55 = arith.constant 0 : index
    %c0_56 = arith.constant 0 : index
    %c0_57 = arith.constant 0 : index
    %51 = vector.load %arg12[%c0_54, %c0_55, %c0_56, %c0_57] : memref<1x1x32x1xf32, #tpu.memory_space<vmem>>, vector<1x1x32x1xf32>
    %52 = vector.shape_cast %51 : vector<1x1x32x1xf32> to vector<32x1xf32>
    %53 = vector.extract_strided_slice %50 {offsets = [0, 0], sizes = [32, 32], strides = [1, 1]} : vector<32x160xf32> to vector<32x32xf32>
    %cst_58 = arith.constant dense<0.000000e+00> : vector<32x16xf32>
    %54 = tpu.matmul %53, %36, %cst_58 {dimension_numbers = #tpu.dot_dimension_numbers<[1], [0], [0], [1], [0, 0, 1, 1], [], []>} : vector<32x32xf32>, vector<32x16xf32>, vector<32x16xf32> -> vector<32x16xf32>
    %55 = vector.broadcast %52 : vector<32x1xf32> to vector<32x16xf32>
    %56 = arith.addf %55, %54 : vector<32x16xf32>
    %57 = vector.extract_strided_slice %50 {offsets = [0, 32], sizes = [32, 32], strides = [1, 1]} : vector<32x160xf32> to vector<32x32xf32>
    %cst_59 = arith.constant dense<0.000000e+00> : vector<32x16xf32>
    %58 = tpu.matmul %57, %39, %cst_59 {dimension_numbers = #tpu.dot_dimension_numbers<[1], [0], [0], [1], [0, 0, 1, 1], [], []>} : vector<32x32xf32>, vector<32x16xf32>, vector<32x16xf32> -> vector<32x16xf32>
    %59 = arith.addf %56, %58 : vector<32x16xf32>
    %60 = vector.extract_strided_slice %50 {offsets = [0, 64], sizes = [32, 32], strides = [1, 1]} : vector<32x160xf32> to vector<32x32xf32>
    %cst_60 = arith.constant dense<0.000000e+00> : vector<32x16xf32>
    %61 = tpu.matmul %60, %42, %cst_60 {dimension_numbers = #tpu.dot_dimension_numbers<[1], [0], [0], [1], [0, 0, 1, 1], [], []>} : vector<32x32xf32>, vector<32x16xf32>, vector<32x16xf32> -> vector<32x16xf32>
    %62 = arith.addf %59, %61 : vector<32x16xf32>
    %63 = vector.extract_strided_slice %50 {offsets = [0, 96], sizes = [32, 32], strides = [1, 1]} : vector<32x160xf32> to vector<32x32xf32>
    %cst_61 = arith.constant dense<0.000000e+00> : vector<32x16xf32>
    %64 = tpu.matmul %63, %45, %cst_61 {dimension_numbers = #tpu.dot_dimension_numbers<[1], [0], [0], [1], [0, 0, 1, 1], [], []>} : vector<32x32xf32>, vector<32x16xf32>, vector<32x16xf32> -> vector<32x16xf32>
    %65 = arith.addf %62, %64 : vector<32x16xf32>
    %66 = vector.extract_strided_slice %50 {offsets = [0, 128], sizes = [32, 32], strides = [1, 1]} : vector<32x160xf32> to vector<32x32xf32>
    %cst_62 = arith.constant dense<0.000000e+00> : vector<32x16xf32>
    %67 = tpu.matmul %66, %48, %cst_62 {dimension_numbers = #tpu.dot_dimension_numbers<[1], [0], [0], [1], [0, 0, 1, 1], [], []>} : vector<32x32xf32>, vector<32x16xf32>, vector<32x16xf32> -> vector<32x16xf32>
    %68 = arith.addf %65, %67 : vector<32x16xf32>
    %69 = vector.extract_strided_slice %68 {offsets = [0, 0], sizes = [16, 16], strides = [1, 1]} : vector<32x16xf32> to vector<16x16xf32>
    %70 = arith.negf %69 : vector<16x16xf32>
    %71 = math.exp %70 : vector<16x16xf32>
    %cst_63 = arith.constant 1.000000e+00 : f32
    %72 = vector.broadcast %cst_63 : f32 to vector<16x16xf32>
    %73 = arith.addf %72, %71 : vector<16x16xf32>
    %74 = arith.divf %72, %73 : vector<16x16xf32>
    %75 = vector.extract_strided_slice %68 {offsets = [16, 0], sizes = [16, 16], strides = [1, 1]} : vector<32x16xf32> to vector<16x16xf32>
    %76 = arith.negf %75 : vector<16x16xf32>
    %77 = math.exp %76 : vector<16x16xf32>
    %cst_64 = arith.constant 1.000000e+00 : f32
    %78 = vector.broadcast %cst_64 : f32 to vector<16x16xf32>
    %79 = arith.addf %78, %77 : vector<16x16xf32>
    %80 = arith.divf %78, %79 : vector<16x16xf32>
    %81 = arith.mulf %74, %35 : vector<16x16xf32>
    %82 = tpu.concatenate %33, %81 in 0 : vector<16x16xf32>, vector<16x16xf32> -> vector<32x16xf32>
    %c0_65 = arith.constant 0 : index
    %c0_66 = arith.constant 0 : index
    %c0_67 = arith.constant 0 : index
    %83 = vector.load %arg8[%c0_65, %c0_66, %c0_67] : memref<4x16x16xf32, #tpu.memory_space<vmem>>, vector<1x16x16xf32>
    %84 = vector.shape_cast %83 : vector<1x16x16xf32> to vector<16x16xf32>
    %cst_68 = arith.constant dense<0.000000e+00> : vector<32x16xf32>
    %85 = tpu.matmul %82, %84, %cst_68 {dimension_numbers = #tpu.dot_dimension_numbers<[1], [0], [0], [1], [0, 0, 1, 1], [], []>} : vector<32x16xf32>, vector<16x16xf32>, vector<32x16xf32> -> vector<32x16xf32>
    %c1_69 = arith.constant 1 : index
    %c0_70 = arith.constant 0 : index
    %c0_71 = arith.constant 0 : index
    %86 = vector.load %arg8[%c1_69, %c0_70, %c0_71] : memref<4x16x16xf32, #tpu.memory_space<vmem>>, vector<1x16x16xf32>
    %87 = vector.shape_cast %86 : vector<1x16x16xf32> to vector<16x16xf32>
    %cst_72 = arith.constant dense<0.000000e+00> : vector<32x16xf32>
    %88 = tpu.matmul %82, %87, %cst_72 {dimension_numbers = #tpu.dot_dimension_numbers<[1], [0], [0], [1], [0, 0, 1, 1], [], []>} : vector<32x16xf32>, vector<16x16xf32>, vector<32x16xf32> -> vector<32x16xf32>
    %c2_73 = arith.constant 2 : index
    %c0_74 = arith.constant 0 : index
    %c0_75 = arith.constant 0 : index
    %89 = vector.load %arg8[%c2_73, %c0_74, %c0_75] : memref<4x16x16xf32, #tpu.memory_space<vmem>>, vector<1x16x16xf32>
    %90 = vector.shape_cast %89 : vector<1x16x16xf32> to vector<16x16xf32>
    %cst_76 = arith.constant dense<0.000000e+00> : vector<32x16xf32>
    %91 = tpu.matmul %82, %90, %cst_76 {dimension_numbers = #tpu.dot_dimension_numbers<[1], [0], [0], [1], [0, 0, 1, 1], [], []>} : vector<32x16xf32>, vector<16x16xf32>, vector<32x16xf32> -> vector<32x16xf32>
    %c3_77 = arith.constant 3 : index
    %c0_78 = arith.constant 0 : index
    %c0_79 = arith.constant 0 : index
    %92 = vector.load %arg8[%c3_77, %c0_78, %c0_79] : memref<4x16x16xf32, #tpu.memory_space<vmem>>, vector<1x16x16xf32>
    %93 = vector.shape_cast %92 : vector<1x16x16xf32> to vector<16x16xf32>
    %cst_80 = arith.constant dense<0.000000e+00> : vector<32x16xf32>
    %94 = tpu.matmul %82, %93, %cst_80 {dimension_numbers = #tpu.dot_dimension_numbers<[1], [0], [0], [1], [0, 0, 1, 1], [], []>} : vector<32x16xf32>, vector<16x16xf32>, vector<32x16xf32> -> vector<32x16xf32>
    %c0_81 = arith.constant 0 : index
    %c0_82 = arith.constant 0 : index
    %c0_83 = arith.constant 0 : index
    %c0_84 = arith.constant 0 : index
    %95 = vector.load %arg13[%c0_81, %c0_82, %c0_83, %c0_84] : memref<1x1x16x160xf32, #tpu.memory_space<vmem>>, vector<1x1x16x160xf32>
    %96 = vector.shape_cast %95 : vector<1x1x16x160xf32> to vector<16x160xf32>
    %c0_85 = arith.constant 0 : index
    %c0_86 = arith.constant 0 : index
    %c0_87 = arith.constant 0 : index
    %c0_88 = arith.constant 0 : index
    %97 = vector.load %arg14[%c0_85, %c0_86, %c0_87, %c0_88] : memref<1x1x16x1xf32, #tpu.memory_space<vmem>>, vector<1x1x16x1xf32>
    %98 = vector.shape_cast %97 : vector<1x1x16x1xf32> to vector<16x1xf32>
    %99 = vector.extract_strided_slice %96 {offsets = [0, 0], sizes = [16, 32], strides = [1, 1]} : vector<16x160xf32> to vector<16x32xf32>
    %cst_89 = arith.constant dense<0.000000e+00> : vector<16x16xf32>
    %100 = tpu.matmul %99, %82, %cst_89 {dimension_numbers = #tpu.dot_dimension_numbers<[1], [0], [0], [1], [0, 0, 1, 1], [], []>} : vector<16x32xf32>, vector<32x16xf32>, vector<16x16xf32> -> vector<16x16xf32>
    %101 = vector.broadcast %98 : vector<16x1xf32> to vector<16x16xf32>
    %102 = arith.addf %101, %100 : vector<16x16xf32>
    %103 = vector.extract_strided_slice %96 {offsets = [0, 32], sizes = [16, 32], strides = [1, 1]} : vector<16x160xf32> to vector<16x32xf32>
    %cst_90 = arith.constant dense<0.000000e+00> : vector<16x16xf32>
    %104 = tpu.matmul %103, %85, %cst_90 {dimension_numbers = #tpu.dot_dimension_numbers<[1], [0], [0], [1], [0, 0, 1, 1], [], []>} : vector<16x32xf32>, vector<32x16xf32>, vector<16x16xf32> -> vector<16x16xf32>
    %105 = arith.addf %102, %104 : vector<16x16xf32>
    %106 = vector.extract_strided_slice %96 {offsets = [0, 64], sizes = [16, 32], strides = [1, 1]} : vector<16x160xf32> to vector<16x32xf32>
    %cst_91 = arith.constant dense<0.000000e+00> : vector<16x16xf32>
    %107 = tpu.matmul %106, %88, %cst_91 {dimension_numbers = #tpu.dot_dimension_numbers<[1], [0], [0], [1], [0, 0, 1, 1], [], []>} : vector<16x32xf32>, vector<32x16xf32>, vector<16x16xf32> -> vector<16x16xf32>
    %108 = arith.addf %105, %107 : vector<16x16xf32>
    %109 = vector.extract_strided_slice %96 {offsets = [0, 96], sizes = [16, 32], strides = [1, 1]} : vector<16x160xf32> to vector<16x32xf32>
    %cst_92 = arith.constant dense<0.000000e+00> : vector<16x16xf32>
    %110 = tpu.matmul %109, %91, %cst_92 {dimension_numbers = #tpu.dot_dimension_numbers<[1], [0], [0], [1], [0, 0, 1, 1], [], []>} : vector<16x32xf32>, vector<32x16xf32>, vector<16x16xf32> -> vector<16x16xf32>
    %111 = arith.addf %108, %110 : vector<16x16xf32>
    %112 = vector.extract_strided_slice %96 {offsets = [0, 128], sizes = [16, 32], strides = [1, 1]} : vector<16x160xf32> to vector<16x32xf32>
    %cst_93 = arith.constant dense<0.000000e+00> : vector<16x16xf32>
    %113 = tpu.matmul %112, %94, %cst_93 {dimension_numbers = #tpu.dot_dimension_numbers<[1], [0], [0], [1], [0, 0, 1, 1], [], []>} : vector<16x32xf32>, vector<32x16xf32>, vector<16x16xf32> -> vector<16x16xf32>
    %114 = arith.addf %111, %113 : vector<16x16xf32>
    %115 = math.tanh %114 : vector<16x16xf32>
    %116 = arith.mulf %80, %35 : vector<16x16xf32>
    %cst_94 = arith.constant 1.000000e+00 : f32
    %117 = vector.broadcast %cst_94 : f32 to vector<16x16xf32>
    %118 = arith.subf %117, %80 : vector<16x16xf32>
    %119 = arith.mulf %118, %115 : vector<16x16xf32>
    %120 = arith.addf %116, %119 : vector<16x16xf32>
    %c0_95 = arith.constant 0 : index
    %c0_96 = arith.constant 0 : index
    %c0_97 = arith.constant 0 : index
    %121 = vector.load %arg27[%c0_95, %c0_96, %c0_97] : memref<1x16x16xf32, #tpu.memory_space<vmem>>, vector<1x16x16xf32>
    %122 = vector.shape_cast %121 : vector<1x16x16xf32> to vector<16x16xf32>
    %123 = vector.shape_cast %120 : vector<16x16xf32> to vector<1x16x16xf32>
    tpu.vector_store %arg27[%c0_95, %c0_96, %c0_97], %123 {strides = array<i32>} : memref<1x16x16xf32, #tpu.memory_space<vmem>>, vector<1x16x16xf32>,
    %c0_98 = arith.constant 0 : index
    %c0_99 = arith.constant 0 : index
    %c0_100 = arith.constant 0 : index
    %124 = vector.load %arg15[%c0_98, %c0_99, %c0_100] : memref<1x2x16xf32, #tpu.memory_space<vmem>>, vector<1x2x16xf32>
    %125 = vector.shape_cast %124 : vector<1x2x16xf32> to vector<2x16xf32>
    %cst_101 = arith.constant dense<0.000000e+00> : vector<2x16xf32>
    %126 = tpu.matmul %125, %120, %cst_101 {dimension_numbers = #tpu.dot_dimension_numbers<[1], [0], [0], [1], [0, 0, 1, 1], [], []>} : vector<2x16xf32>, vector<16x16xf32>, vector<2x16xf32> -> vector<2x16xf32>
    %c0_102 = arith.constant 0 : index
    %c0_103 = arith.constant 0 : index
    %c0_104 = arith.constant 0 : index
    %127 = vector.load %arg16[%c0_102, %c0_103, %c0_104] : memref<1x2x1xf32, #tpu.memory_space<vmem>>, vector<1x2x1xf32>
    %128 = vector.shape_cast %127 : vector<1x2x1xf32> to vector<2x1xf32>
    %129 = vector.broadcast %128 : vector<2x1xf32> to vector<2x16xf32>
    %130 = arith.addf %126, %129 : vector<2x16xf32>
    %cst_105 = arith.constant 0.000000e+00 : f32
    %131 = vector.broadcast %cst_105 : f32 to vector<2x16xf32>
    %132 = arith.cmpf ogt, %10, %131 : vector<2x16xf32>
    %133 = arith.select %132, %8, %130 : vector<2x16xi1>, vector<2x16xf32>
    %134 = vector.extract_strided_slice %16 {offsets = [0, 0], sizes = [16, 2], strides = [1, 1]} : vector<16x6xf32> to vector<16x2xf32>
    %cst_106 = arith.constant dense<0.000000e+00> : vector<16x16xf32>
    %135 = tpu.matmul %134, %133, %cst_106 {dimension_numbers = #tpu.dot_dimension_numbers<[1], [0], [0], [1], [0, 0, 1, 1], [], []>} : vector<16x2xf32>, vector<2x16xf32>, vector<16x16xf32> -> vector<16x16xf32>
    %136 = vector.extract_strided_slice %16 {offsets = [0, 2], sizes = [16, 2], strides = [1, 1]} : vector<16x6xf32> to vector<16x2xf32>
    %cst_107 = arith.constant dense<0.000000e+00> : vector<16x16xf32>
    %137 = tpu.matmul %136, %10, %cst_107 {dimension_numbers = #tpu.dot_dimension_numbers<[1], [0], [0], [1], [0, 0, 1, 1], [], []>} : vector<16x2xf32>, vector<2x16xf32>, vector<16x16xf32> -> vector<16x16xf32>
    %138 = arith.addf %135, %137 : vector<16x16xf32>
    %139 = vector.extract_strided_slice %16 {offsets = [0, 4], sizes = [16, 2], strides = [1, 1]} : vector<16x6xf32> to vector<16x2xf32>
    %cst_108 = arith.constant dense<0.000000e+00> : vector<16x16xf32>
    %140 = tpu.matmul %139, %14, %cst_108 {dimension_numbers = #tpu.dot_dimension_numbers<[1], [0], [0], [1], [0, 0, 1, 1], [], []>} : vector<16x2xf32>, vector<2x16xf32>, vector<16x16xf32> -> vector<16x16xf32>
    %141 = arith.addf %138, %140 : vector<16x16xf32>
    %142 = vector.broadcast %18 : vector<16x1xf32> to vector<16x16xf32>
    %143 = arith.addf %141, %142 : vector<16x16xf32>
    %144 = arith.addf %143, %12 : vector<16x16xf32>
    %145 = tpu.concatenate %144, %120 in 0 : vector<16x16xf32>, vector<16x16xf32> -> vector<32x16xf32>
    %c0_109 = arith.constant 0 : index
    %c0_110 = arith.constant 0 : index
    %c0_111 = arith.constant 0 : index
    %146 = vector.load %arg17[%c0_109, %c0_110, %c0_111] : memref<1x16x64xf32, #tpu.memory_space<vmem>>, vector<1x16x64xf32>
    %147 = vector.shape_cast %146 : vector<1x16x64xf32> to vector<16x64xf32>
    %c0_112 = arith.constant 0 : index
    %c0_113 = arith.constant 0 : index
    %c0_114 = arith.constant 0 : index
    %148 = vector.load %arg18[%c0_112, %c0_113, %c0_114] : memref<1x16x1xf32, #tpu.memory_space<vmem>>, vector<1x16x1xf32>
    %149 = vector.shape_cast %148 : vector<1x16x1xf32> to vector<16x1xf32>
    %150 = vector.extract_strided_slice %147 {offsets = [0, 0], sizes = [16, 32], strides = [1, 1]} : vector<16x64xf32> to vector<16x32xf32>
    %c0_115 = arith.constant 0 : index
    %c0_116 = arith.constant 0 : index
    %c0_117 = arith.constant 0 : index
    %151 = vector.load %arg8[%c0_115, %c0_116, %c0_117] : memref<4x16x16xf32, #tpu.memory_space<vmem>>, vector<1x16x16xf32>
    %152 = vector.shape_cast %151 : vector<1x16x16xf32> to vector<16x16xf32>
    %cst_118 = arith.constant dense<0.000000e+00> : vector<32x16xf32>
    %153 = tpu.matmul %145, %152, %cst_118 {dimension_numbers = #tpu.dot_dimension_numbers<[1], [0], [0], [1], [0, 0, 1, 1], [], []>} : vector<32x16xf32>, vector<16x16xf32>, vector<32x16xf32> -> vector<32x16xf32>
    %cst_119 = arith.constant dense<0.000000e+00> : vector<16x16xf32>
    %154 = tpu.matmul %150, %153, %cst_119 {dimension_numbers = #tpu.dot_dimension_numbers<[1], [0], [0], [1], [0, 0, 1, 1], [], []>} : vector<16x32xf32>, vector<32x16xf32>, vector<16x16xf32> -> vector<16x16xf32>
    %155 = vector.broadcast %149 : vector<16x1xf32> to vector<16x16xf32>
    %156 = arith.addf %155, %154 : vector<16x16xf32>
    %157 = vector.extract_strided_slice %147 {offsets = [0, 32], sizes = [16, 32], strides = [1, 1]} : vector<16x64xf32> to vector<16x32xf32>
    %c2_120 = arith.constant 2 : index
    %c0_121 = arith.constant 0 : index
    %c0_122 = arith.constant 0 : index
    %158 = vector.load %arg8[%c2_120, %c0_121, %c0_122] : memref<4x16x16xf32, #tpu.memory_space<vmem>>, vector<1x16x16xf32>
    %159 = vector.shape_cast %158 : vector<1x16x16xf32> to vector<16x16xf32>
    %cst_123 = arith.constant dense<0.000000e+00> : vector<32x16xf32>
    %160 = tpu.matmul %145, %159, %cst_123 {dimension_numbers = #tpu.dot_dimension_numbers<[1], [0], [0], [1], [0, 0, 1, 1], [], []>} : vector<32x16xf32>, vector<16x16xf32>, vector<32x16xf32> -> vector<32x16xf32>
    %cst_124 = arith.constant dense<0.000000e+00> : vector<16x16xf32>
    %161 = tpu.matmul %157, %160, %cst_124 {dimension_numbers = #tpu.dot_dimension_numbers<[1], [0], [0], [1], [0, 0, 1, 1], [], []>} : vector<16x32xf32>, vector<32x16xf32>, vector<16x16xf32> -> vector<16x16xf32>
    %162 = arith.addf %156, %161 : vector<16x16xf32>
    %c0_125 = arith.constant 0 : index
    %c0_126 = arith.constant 0 : index
    %c0_127 = arith.constant 0 : index
    %163 = vector.load %arg19[%c0_125, %c0_126, %c0_127] : memref<1x16x32xf32, #tpu.memory_space<vmem>>, vector<1x16x32xf32>
    %164 = vector.shape_cast %163 : vector<1x16x32xf32> to vector<16x32xf32>
    %165 = vector.extract_strided_slice %164 {offsets = [0, 0], sizes = [16, 16], strides = [1, 1]} : vector<16x32xf32> to vector<16x16xf32>
    %cst_128 = arith.constant dense<0.000000e+00> : vector<16x16xf32>
    %166 = tpu.matmul %165, %162, %cst_128 {dimension_numbers = #tpu.dot_dimension_numbers<[1], [0], [0], [1], [0, 0, 1, 1], [], []>} : vector<16x16xf32>, vector<16x16xf32>, vector<16x16xf32> -> vector<16x16xf32>
    %167 = vector.extract_strided_slice %164 {offsets = [0, 16], sizes = [16, 16], strides = [1, 1]} : vector<16x32xf32> to vector<16x16xf32>
    %cst_129 = arith.constant dense<0.000000e+00> : vector<16x16xf32>
    %168 = tpu.matmul %167, %120, %cst_129 {dimension_numbers = #tpu.dot_dimension_numbers<[1], [0], [0], [1], [0, 0, 1, 1], [], []>} : vector<16x16xf32>, vector<16x16xf32>, vector<16x16xf32> -> vector<16x16xf32>
    %169 = arith.addf %166, %168 : vector<16x16xf32>
    %c0_130 = arith.constant 0 : index
    %c0_131 = arith.constant 0 : index
    %c0_132 = arith.constant 0 : index
    %170 = vector.load %arg20[%c0_130, %c0_131, %c0_132] : memref<1x16x1xf32, #tpu.memory_space<vmem>>, vector<1x16x1xf32>
    %171 = vector.shape_cast %170 : vector<1x16x1xf32> to vector<16x1xf32>
    %172 = vector.broadcast %171 : vector<16x1xf32> to vector<16x16xf32>
    %173 = arith.addf %169, %172 : vector<16x16xf32>
    %174 = arith.index_cast %arg0 : i32 to index
    %175 = memref.load %arg23[%174] : memref<2xf32, #tpu.memory_space<smem>>
    %cst_133 = arith.constant 0.000000e+00 : f32
    %176 = vector.broadcast %cst_133 : f32 to vector<16x16xf32>
    %177 = arith.cmpf oge, %173, %176 : vector<16x16xf32>
    %178 = vector.broadcast %175 : f32 to vector<16x16xf32>
    %179 = arith.mulf %178, %173 : vector<16x16xf32>
    %180 = arith.select %177, %173, %179 : vector<16x16xi1>, vector<16x16xf32>
    %c0_134 = arith.constant 0 : index
    %c0_135 = arith.constant 0 : index
    %c0_136 = arith.constant 0 : index
    %181 = vector.load %arg21[%c0_134, %c0_135, %c0_136] : memref<1x2x32xf32, #tpu.memory_space<vmem>>, vector<1x2x32xf32>
    %182 = vector.shape_cast %181 : vector<1x2x32xf32> to vector<2x32xf32>
    %183 = vector.extract_strided_slice %182 {offsets = [0, 0], sizes = [2, 16], strides = [1, 1]} : vector<2x32xf32> to vector<2x16xf32>
    %cst_137 = arith.constant dense<0.000000e+00> : vector<2x16xf32>
    %184 = tpu.matmul %183, %180, %cst_137 {dimension_numbers = #tpu.dot_dimension_numbers<[1], [0], [0], [1], [0, 0, 1, 1], [], []>} : vector<2x16xf32>, vector<16x16xf32>, vector<2x16xf32> -> vector<2x16xf32>
    %185 = vector.extract_strided_slice %182 {offsets = [0, 16], sizes = [2, 16], strides = [1, 1]} : vector<2x32xf32> to vector<2x16xf32>
    %cst_138 = arith.constant dense<0.000000e+00> : vector<2x16xf32>
    %186 = tpu.matmul %185, %120, %cst_138 {dimension_numbers = #tpu.dot_dimension_numbers<[1], [0], [0], [1], [0, 0, 1, 1], [], []>} : vector<2x16xf32>, vector<16x16xf32>, vector<2x16xf32> -> vector<2x16xf32>
    %187 = arith.addf %184, %186 : vector<2x16xf32>
    %c0_139 = arith.constant 0 : index
    %c0_140 = arith.constant 0 : index
    %c0_141 = arith.constant 0 : index
    %188 = vector.load %arg22[%c0_139, %c0_140, %c0_141] : memref<1x2x1xf32, #tpu.memory_space<vmem>>, vector<1x2x1xf32>
    %189 = vector.shape_cast %188 : vector<1x2x1xf32> to vector<2x1xf32>
    %190 = vector.broadcast %189 : vector<2x1xf32> to vector<2x16xf32>
    %191 = arith.addf %187, %190 : vector<2x16xf32>
    %c0_142 = arith.constant 0 : index
    %c0_143 = arith.constant 0 : index
    %192 = vector.load %arg28[%c0_142, %c0_143] : memref<2x16xf32, #tpu.memory_space<vmem>>, vector<2x16xf32>
    tpu.vector_store %arg28[%c0_142, %c0_143], %191 {strides = array<i32>} : memref<2x16xf32, #tpu.memory_space<vmem>>, vector<2x16xf32>,
    %c0_144 = arith.constant 0 : index
    %c0_145 = arith.constant 0 : index
    %c0_146 = arith.constant 0 : index
    %c0_147 = arith.constant 0 : index
    %193 = vector.load %arg24[%c0_144, %c0_145, %c0_146, %c0_147] : memref<1x1x2x16xf32, #tpu.memory_space<vmem>>, vector<1x1x2x16xf32>
    %194 = vector.shape_cast %193 : vector<1x1x2x16xf32> to vector<2x16xf32>
    %195 = vector.shape_cast %191 : vector<2x16xf32> to vector<1x1x2x16xf32>
    tpu.vector_store %arg24[%c0_144, %c0_145, %c0_146, %c0_147], %195 {strides = array<i32>} : memref<1x1x2x16xf32, #tpu.memory_space<vmem>>, vector<1x1x2x16xf32>,
    %c0_148 = arith.constant 0 : index
    %c0_149 = arith.constant 0 : index
    %c0_150 = arith.constant 0 : index
    %c0_151 = arith.constant 0 : index
    %196 = vector.load %arg25[%c0_148, %c0_149, %c0_150, %c0_151] : memref<1x1x2x16xf32, #tpu.memory_space<vmem>>, vector<1x1x2x16xf32>
    %197 = vector.shape_cast %196 : vector<1x1x2x16xf32> to vector<2x16xf32>
    %198 = vector.shape_cast %130 : vector<2x16xf32> to vector<1x1x2x16xf32>
    tpu.vector_store %arg25[%c0_148, %c0_149, %c0_150, %c0_151], %198 {strides = array<i32>} : memref<1x1x2x16xf32, #tpu.memory_space<vmem>>, vector<1x1x2x16xf32>,
    %199 = tpu.concatenate %180, %120 in 0 : vector<16x16xf32>, vector<16x16xf32> -> vector<32x16xf32>
    %c0_152 = arith.constant 0 : index
    %c0_153 = arith.constant 0 : index
    %c0_154 = arith.constant 0 : index
    %c0_155 = arith.constant 0 : index
    %200 = vector.load %arg26[%c0_152, %c0_153, %c0_154, %c0_155] : memref<1x1x32x16xf32, #tpu.memory_space<vmem>>, vector<1x1x32x16xf32>
    %201 = vector.shape_cast %200 : vector<1x1x32x16xf32> to vector<32x16xf32>
    %202 = vector.shape_cast %199 : vector<32x16xf32> to vector<1x1x32x16xf32>
    tpu.vector_store %arg26[%c0_152, %c0_153, %c0_154, %c0_155], %202 {strides = array<i32>} : memref<1x1x32x16xf32, #tpu.memory_space<vmem>>, vector<1x1x32x16xf32>,
    return
  }
  func.func @transform_0(%arg0: i32, %arg1: i32) -> (i32, i32, i32, i32) {
    %c0_i32 = arith.constant 0 : i32
    %c0_i32_0 = arith.constant 0 : i32
    %c0_i32_1 = arith.constant 0 : i32
    return %arg0, %arg1, %c0_i32, %c0_i32_0 : i32, i32, i32, i32
  }
  func.func @transform_1(%arg0: i32, %arg1: i32) -> (i32, i32, i32, i32) {
    %c0_i32 = arith.constant 0 : i32
    %c0_i32_0 = arith.constant 0 : i32
    %c0_i32_1 = arith.constant 0 : i32
    return %arg0, %arg1, %c0_i32, %c0_i32_0 : i32, i32, i32, i32
  }
  func.func @transform_2(%arg0: i32, %arg1: i32) -> (i32, i32, i32, i32) {
    %c0_i32 = arith.constant 0 : i32
    %c0_i32_0 = arith.constant 0 : i32
    %c0_i32_1 = arith.constant 0 : i32
    return %arg0, %arg1, %c0_i32, %c0_i32_0 : i32, i32, i32, i32
  }
  func.func @transform_3(%arg0: i32, %arg1: i32) -> (i32, i32, i32, i32) {
    %c0_i32 = arith.constant 0 : i32
    %c0_i32_0 = arith.constant 0 : i32
    %c0_i32_1 = arith.constant 0 : i32
    return %arg0, %arg1, %c0_i32, %c0_i32_0 : i32, i32, i32, i32
  }
  func.func @transform_4(%arg0: i32, %arg1: i32) -> (i32, i32, i32, i32) {
    %c0_i32 = arith.constant 0 : i32
    %c0_i32_0 = arith.constant 0 : i32
    %c0_i32_1 = arith.constant 0 : i32
    return %arg0, %arg1, %c0_i32, %c0_i32_0 : i32, i32, i32, i32
  }
  func.func @transform_5(%arg0: i32, %arg1: i32) -> (i32, i32, i32) {
    %c0_i32 = arith.constant 0 : i32
    %c0_i32_0 = arith.constant 0 : i32
    %c0_i32_1 = arith.constant 0 : i32
    return %arg1, %c0_i32, %c0_i32_0 : i32, i32, i32
  }
  func.func @transform_6(%arg0: i32, %arg1: i32) -> (i32, i32, i32) {
    %c0_i32 = arith.constant 0 : i32
    %c0_i32_0 = arith.constant 0 : i32
    %c0_i32_1 = arith.constant 0 : i32
    %c0_i32_2 = arith.constant 0 : i32
    return %c0_i32, %c0_i32_0, %c0_i32_1 : i32, i32, i32
  }
  func.func @transform_7(%arg0: i32, %arg1: i32) -> (i32, i32, i32) {
    %c0_i32 = arith.constant 0 : i32
    %c0_i32_0 = arith.constant 0 : i32
    %c0_i32_1 = arith.constant 0 : i32
    return %arg0, %c0_i32, %c0_i32_0 : i32, i32, i32
  }
  func.func @transform_8(%arg0: i32, %arg1: i32) -> (i32, i32, i32) {
    %c0_i32 = arith.constant 0 : i32
    %c0_i32_0 = arith.constant 0 : i32
    %c0_i32_1 = arith.constant 0 : i32
    return %arg0, %c0_i32, %c0_i32_0 : i32, i32, i32
  }
  func.func @transform_9(%arg0: i32, %arg1: i32) -> (i32, i32, i32, i32) {
    %c0_i32 = arith.constant 0 : i32
    %c0_i32_0 = arith.constant 0 : i32
    %c0_i32_1 = arith.constant 0 : i32
    %c0_i32_2 = arith.constant 0 : i32
    return %arg0, %c0_i32, %c0_i32_0, %c0_i32_1 : i32, i32, i32, i32
  }
  func.func @transform_10(%arg0: i32, %arg1: i32) -> (i32, i32, i32, i32) {
    %c0_i32 = arith.constant 0 : i32
    %c0_i32_0 = arith.constant 0 : i32
    %c0_i32_1 = arith.constant 0 : i32
    %c0_i32_2 = arith.constant 0 : i32
    return %arg0, %c0_i32, %c0_i32_0, %c0_i32_1 : i32, i32, i32, i32
  }
  func.func @transform_11(%arg0: i32, %arg1: i32) -> (i32, i32, i32, i32) {
    %c0_i32 = arith.constant 0 : i32
    %c0_i32_0 = arith.constant 0 : i32
    %c0_i32_1 = arith.constant 0 : i32
    %c0_i32_2 = arith.constant 0 : i32
    return %arg0, %c0_i32, %c0_i32_0, %c0_i32_1 : i32, i32, i32, i32
  }
  func.func @transform_12(%arg0: i32, %arg1: i32) -> (i32, i32, i32, i32) {
    %c0_i32 = arith.constant 0 : i32
    %c0_i32_0 = arith.constant 0 : i32
    %c0_i32_1 = arith.constant 0 : i32
    %c0_i32_2 = arith.constant 0 : i32
    return %arg0, %c0_i32, %c0_i32_0, %c0_i32_1 : i32, i32, i32, i32
  }
  func.func @transform_13(%arg0: i32, %arg1: i32) -> (i32, i32, i32) {
    %c0_i32 = arith.constant 0 : i32
    %c0_i32_0 = arith.constant 0 : i32
    %c0_i32_1 = arith.constant 0 : i32
    return %arg0, %c0_i32, %c0_i32_0 : i32, i32, i32
  }
  func.func @transform_14(%arg0: i32, %arg1: i32) -> (i32, i32, i32) {
    %c0_i32 = arith.constant 0 : i32
    %c0_i32_0 = arith.constant 0 : i32
    %c0_i32_1 = arith.constant 0 : i32
    return %arg0, %c0_i32, %c0_i32_0 : i32, i32, i32
  }
  func.func @transform_15(%arg0: i32, %arg1: i32) -> (i32, i32, i32) {
    %c0_i32 = arith.constant 0 : i32
    %c0_i32_0 = arith.constant 0 : i32
    %c0_i32_1 = arith.constant 0 : i32
    return %arg0, %c0_i32, %c0_i32_0 : i32, i32, i32
  }
  func.func @transform_16(%arg0: i32, %arg1: i32) -> (i32, i32, i32) {
    %c0_i32 = arith.constant 0 : i32
    %c0_i32_0 = arith.constant 0 : i32
    %c0_i32_1 = arith.constant 0 : i32
    return %arg0, %c0_i32, %c0_i32_0 : i32, i32, i32
  }
  func.func @transform_17(%arg0: i32, %arg1: i32) -> (i32, i32, i32) {
    %c0_i32 = arith.constant 0 : i32
    %c0_i32_0 = arith.constant 0 : i32
    %c0_i32_1 = arith.constant 0 : i32
    return %arg0, %c0_i32, %c0_i32_0 : i32, i32, i32
  }
  func.func @transform_18(%arg0: i32, %arg1: i32) -> (i32, i32, i32) {
    %c0_i32 = arith.constant 0 : i32
    %c0_i32_0 = arith.constant 0 : i32
    %c0_i32_1 = arith.constant 0 : i32
    return %arg0, %c0_i32, %c0_i32_0 : i32, i32, i32
  }
  func.func @transform_19(%arg0: i32, %arg1: i32) -> (i32, i32, i32) {
    %c0_i32 = arith.constant 0 : i32
    %c0_i32_0 = arith.constant 0 : i32
    %c0_i32_1 = arith.constant 0 : i32
    return %arg0, %c0_i32, %c0_i32_0 : i32, i32, i32
  }
  func.func @transform_20(%arg0: i32, %arg1: i32) -> (i32, i32, i32) {
    %c0_i32 = arith.constant 0 : i32
    %c0_i32_0 = arith.constant 0 : i32
    %c0_i32_1 = arith.constant 0 : i32
    return %arg0, %c0_i32, %c0_i32_0 : i32, i32, i32
  }
  func.func @transform_21(%arg0: i32, %arg1: i32) -> i32 {
    %c0_i32 = arith.constant 0 : i32
    %c0_i32_0 = arith.constant 0 : i32
    return %c0_i32 : i32
  }
  func.func @transform_22(%arg0: i32, %arg1: i32) -> (i32, i32, i32, i32) {
    %c0_i32 = arith.constant 0 : i32
    %c0_i32_0 = arith.constant 0 : i32
    %c0_i32_1 = arith.constant 0 : i32
    return %arg0, %arg1, %c0_i32, %c0_i32_0 : i32, i32, i32, i32
  }
  func.func @transform_23(%arg0: i32, %arg1: i32) -> (i32, i32, i32, i32) {
    %c0_i32 = arith.constant 0 : i32
    %c0_i32_0 = arith.constant 0 : i32
    %c0_i32_1 = arith.constant 0 : i32
    return %arg0, %arg1, %c0_i32, %c0_i32_0 : i32, i32, i32, i32
  }
  func.func @transform_24(%arg0: i32, %arg1: i32) -> (i32, i32, i32, i32) {
    %c0_i32 = arith.constant 0 : i32
    %c0_i32_0 = arith.constant 0 : i32
    %c0_i32_1 = arith.constant 0 : i32
    return %arg0, %arg1, %c0_i32, %c0_i32_0 : i32, i32, i32, i32
  }
}

module attributes {stable_mosaic.version = 11 : i64} {
  func.func @_merge_kernel(%arg0: i32, %arg1: memref<32x64xf32, #tpu.memory_space<vmem>>, %arg2: memref<32x64xf32, #tpu.memory_space<vmem>>, %arg3: memref<2x64xf32, #tpu.memory_space<vmem>>, %arg4: memref<2x64xf32, #tpu.memory_space<vmem>>, %arg5: memref<32x64xf32, #tpu.memory_space<vmem>>, %arg6: memref<32x1xf32, #tpu.memory_space<vmem>>, %arg7: memref<2x32xf32, #tpu.memory_space<vmem>>, %arg8: memref<2x1xf32, #tpu.memory_space<vmem>>, %arg9: memref<2x64xf32, #tpu.memory_space<vmem>>) attributes {dimension_semantics = [#tpu.dimension_semantics<arbitrary>], iteration_bounds = array<i64: 1>, scalar_prefetch = 0 : i64, scratch_operands = 0 : i64, tpu.core_type = #tpu.core_type<tc>, window_params = [{pipeline_mode = #tpu.pipeline_mode<synchronous>, transform_indices = @transform_0, window_bounds = array<i64: 32, 64>}, {pipeline_mode = #tpu.pipeline_mode<synchronous>, transform_indices = @transform_1, window_bounds = array<i64: 32, 64>}, {pipeline_mode = #tpu.pipeline_mode<synchronous>, transform_indices = @transform_2, window_bounds = array<i64: 2, 64>}, {pipeline_mode = #tpu.pipeline_mode<synchronous>, transform_indices = @transform_3, window_bounds = array<i64: 2, 64>}, {pipeline_mode = #tpu.pipeline_mode<synchronous>, transform_indices = @transform_4, window_bounds = array<i64: 32, 64>}, {pipeline_mode = #tpu.pipeline_mode<synchronous>, transform_indices = @transform_5, window_bounds = array<i64: 32, 1>}, {pipeline_mode = #tpu.pipeline_mode<synchronous>, transform_indices = @transform_6, window_bounds = array<i64: 2, 32>}, {pipeline_mode = #tpu.pipeline_mode<synchronous>, transform_indices = @transform_7, window_bounds = array<i64: 2, 1>}, {pipeline_mode = #tpu.pipeline_mode<synchronous>, transform_indices = @transform_8, window_bounds = array<i64: 2, 64>}]} {
    %c0 = arith.constant 0 : index
    %c0_0 = arith.constant 0 : index
    %0 = vector.load %arg5[%c0, %c0_0] : memref<32x64xf32, #tpu.memory_space<vmem>>, vector<32x64xf32>
    %1 = vector.extract_strided_slice %0 {offsets = [0, 0], sizes = [32, 32], strides = [1, 1]} : vector<32x64xf32> to vector<32x32xf32>
    %c0_1 = arith.constant 0 : index
    %c0_2 = arith.constant 0 : index
    %2 = vector.load %arg1[%c0_1, %c0_2] : memref<32x64xf32, #tpu.memory_space<vmem>>, vector<32x64xf32>
    %cst = arith.constant dense<0.000000e+00> : vector<32x64xf32>
    %3 = tpu.matmul %1, %2, %cst {dimension_numbers = #tpu.dot_dimension_numbers<[1], [0], [0], [1], [0, 0, 1, 1], [], []>} : vector<32x32xf32>, vector<32x64xf32>, vector<32x64xf32> -> vector<32x64xf32>
    %4 = vector.extract_strided_slice %0 {offsets = [0, 32], sizes = [32, 32], strides = [1, 1]} : vector<32x64xf32> to vector<32x32xf32>
    %c0_3 = arith.constant 0 : index
    %c0_4 = arith.constant 0 : index
    %5 = vector.load %arg2[%c0_3, %c0_4] : memref<32x64xf32, #tpu.memory_space<vmem>>, vector<32x64xf32>
    %cst_5 = arith.constant dense<0.000000e+00> : vector<32x64xf32>
    %6 = tpu.matmul %4, %5, %cst_5 {dimension_numbers = #tpu.dot_dimension_numbers<[1], [0], [0], [1], [0, 0, 1, 1], [], []>} : vector<32x32xf32>, vector<32x64xf32>, vector<32x64xf32> -> vector<32x64xf32>
    %7 = arith.addf %3, %6 : vector<32x64xf32>
    %c0_6 = arith.constant 0 : index
    %c0_7 = arith.constant 0 : index
    %8 = vector.load %arg6[%c0_6, %c0_7] : memref<32x1xf32, #tpu.memory_space<vmem>>, vector<32x1xf32>
    %9 = vector.broadcast %8 : vector<32x1xf32> to vector<32x64xf32>
    %10 = arith.addf %7, %9 : vector<32x64xf32>
    %cst_8 = arith.constant 0.000000e+00 : f32
    %11 = vector.broadcast %cst_8 : f32 to vector<32x64xf32>
    %12 = arith.maximumf %10, %11 : vector<32x64xf32>
    %c0_9 = arith.constant 0 : index
    %c0_10 = arith.constant 0 : index
    %13 = vector.load %arg7[%c0_9, %c0_10] : memref<2x32xf32, #tpu.memory_space<vmem>>, vector<2x32xf32>
    %cst_11 = arith.constant dense<0.000000e+00> : vector<2x64xf32>
    %14 = tpu.matmul %13, %12, %cst_11 {dimension_numbers = #tpu.dot_dimension_numbers<[1], [0], [0], [1], [0, 0, 1, 1], [], []>} : vector<2x32xf32>, vector<32x64xf32>, vector<2x64xf32> -> vector<2x64xf32>
    %c0_12 = arith.constant 0 : index
    %c0_13 = arith.constant 0 : index
    %15 = vector.load %arg8[%c0_12, %c0_13] : memref<2x1xf32, #tpu.memory_space<vmem>>, vector<2x1xf32>
    %16 = vector.broadcast %15 : vector<2x1xf32> to vector<2x64xf32>
    %17 = arith.addf %14, %16 : vector<2x64xf32>
    %c0_14 = arith.constant 0 : index
    %c0_15 = arith.constant 0 : index
    %18 = vector.load %arg4[%c0_14, %c0_15] : memref<2x64xf32, #tpu.memory_space<vmem>>, vector<2x64xf32>
    %cst_16 = arith.constant 0.000000e+00 : f32
    %19 = vector.broadcast %cst_16 : f32 to vector<2x64xf32>
    %20 = arith.cmpf ogt, %18, %19 : vector<2x64xf32>
    %c0_17 = arith.constant 0 : index
    %c0_18 = arith.constant 0 : index
    %21 = vector.load %arg3[%c0_17, %c0_18] : memref<2x64xf32, #tpu.memory_space<vmem>>, vector<2x64xf32>
    %22 = arith.select %20, %21, %17 : vector<2x64xi1>, vector<2x64xf32>
    %c0_19 = arith.constant 0 : index
    %c0_20 = arith.constant 0 : index
    %23 = vector.load %arg9[%c0_19, %c0_20] : memref<2x64xf32, #tpu.memory_space<vmem>>, vector<2x64xf32>
    tpu.vector_store %arg9[%c0_19, %c0_20], %22 {strides = array<i32>} : memref<2x64xf32, #tpu.memory_space<vmem>>, vector<2x64xf32>,
    return
  }
  func.func @transform_0(%arg0: i32) -> (i32, i32) {
    %c0_i32 = arith.constant 0 : i32
    %c0_i32_0 = arith.constant 0 : i32
    %c0_i32_1 = arith.constant 0 : i32
    return %c0_i32, %c0_i32_0 : i32, i32
  }
  func.func @transform_1(%arg0: i32) -> (i32, i32) {
    %c0_i32 = arith.constant 0 : i32
    %c0_i32_0 = arith.constant 0 : i32
    %c0_i32_1 = arith.constant 0 : i32
    return %c0_i32, %c0_i32_0 : i32, i32
  }
  func.func @transform_2(%arg0: i32) -> (i32, i32) {
    %c0_i32 = arith.constant 0 : i32
    %c0_i32_0 = arith.constant 0 : i32
    %c0_i32_1 = arith.constant 0 : i32
    return %c0_i32, %c0_i32_0 : i32, i32
  }
  func.func @transform_3(%arg0: i32) -> (i32, i32) {
    %c0_i32 = arith.constant 0 : i32
    %c0_i32_0 = arith.constant 0 : i32
    %c0_i32_1 = arith.constant 0 : i32
    return %c0_i32, %c0_i32_0 : i32, i32
  }
  func.func @transform_4(%arg0: i32) -> (i32, i32) {
    %c0_i32 = arith.constant 0 : i32
    %c0_i32_0 = arith.constant 0 : i32
    %c0_i32_1 = arith.constant 0 : i32
    return %c0_i32, %c0_i32_0 : i32, i32
  }
  func.func @transform_5(%arg0: i32) -> (i32, i32) {
    %c0_i32 = arith.constant 0 : i32
    %c0_i32_0 = arith.constant 0 : i32
    %c0_i32_1 = arith.constant 0 : i32
    return %c0_i32, %c0_i32_0 : i32, i32
  }
  func.func @transform_6(%arg0: i32) -> (i32, i32) {
    %c0_i32 = arith.constant 0 : i32
    %c0_i32_0 = arith.constant 0 : i32
    %c0_i32_1 = arith.constant 0 : i32
    return %c0_i32, %c0_i32_0 : i32, i32
  }
  func.func @transform_7(%arg0: i32) -> (i32, i32) {
    %c0_i32 = arith.constant 0 : i32
    %c0_i32_0 = arith.constant 0 : i32
    %c0_i32_1 = arith.constant 0 : i32
    return %c0_i32, %c0_i32_0 : i32, i32
  }
  func.func @transform_8(%arg0: i32) -> (i32, i32) {
    %c0_i32 = arith.constant 0 : i32
    %c0_i32_0 = arith.constant 0 : i32
    %c0_i32_1 = arith.constant 0 : i32
    return %c0_i32, %c0_i32_0 : i32, i32
  }
}

</mosaic_0001>

<bundles_post_ra>
// kernel: squeeze.7
= control target key start
LH: loop header
LB: loop body
LE: loop exit
PB: predicated region body
PF: predicated region fallthrough
CT: control target
= control target key end

     0   :  { %vm21_vm0 = vcmask 64512   ;;  %vm41_vm1 = vcmask 1047556   ;;  %s169_s0 = inlined_call_operand.vmem [shape: f32[1,4,2,16], index: 0, kind: input, shape index: {}]   ;;  %s170_s1 = inlined_call_operand.vmem [shape: f32[4,2,2,8], index: 1, kind: output, shape index: {}]  }
   0x1   :  { %v105_v0 = vld [vmem:[%s169_s0 + $0x6] sm:$0x3]  ;;  %v106_v1 = vld [vmem:[%s169_s0 + $0x4] sm:$0x3]  ;;  %v107_v2 = vld [vmem:[%s169_s0 + $0x2] sm:$0x3] }
   0x2   :  { %8 = vst [vmem:[#allocation1 + $0x18] sm:$0x3] %v105_v0  ;;  %13 = vst [vmem:[#allocation1 + $0x10] sm:$0x3] %v106_v1  ;;  %v18_v3 = vld [vmem:[%s169_s0] sm:$0x3] }
   0x3   :  { %17 = vst [vmem:[#allocation1 + $0x8] sm:$0x3] %v107_v2  ;;  %19 = vst [vmem:[#allocation1] sm:$0x3] %v18_v3  ;;  %s116_s0 = smov 120  }
   0x9   :  { %v29_v5 = vld [vmem:[#allocation1 + $0x10] sm:$0x3]   ;;  %v34_v6 = vld [vmem:[#allocation1 + $0x18] sm:$0x3]  }
   0xa   :  { %v24_v4 = vld [vmem:[#allocation1 + $0x8] sm:$0x3]   ;;  %v20_v7 = vld [vmem:[#allocation1] sm:$0x3]  }
   0xb   :  { %27 = vst.msk [vmem:[#allocation0 + $0x10] ss:$8 sm:$0x3] %vm21_vm0, %v24_v4   ;;  %32 = vst.msk [vmem:[#allocation0 + $0x20] ss:$8 sm:$0x3] %vm21_vm0, %v29_v5  }
   0xc   :  { %37 = vst.msk [vmem:[#allocation0 + $0x30] ss:$8 sm:$0x3] %vm21_vm0, %v34_v6   ;;  %v38_v8 = vld.sshfl [vmem:[#allocation1] sm:$0xff pattern:$0x99999810]  }
   0xd   :  { %22 = vst.msk [vmem:[#allocation0] ss:$8 sm:$0x3] %vm21_vm0, %v20_v7   ;;  %v40_v9 = vld.sshfl [vmem:[#allocation1 + $0x10] sm:$0xff pattern:$0x98100000]  }
   0xe   :  { %v42_v10 = vsel %vm41_vm1, %v40_v9, %v38_v8 }
   0xf   :  { %43 = vrot.lane.b32.xlu0 %v42_v10, %s116_s0 }
  0x81   :  { %v44_v11 = vpop.permute.xlu0 %43  }
  0x82   :  { %47 = vst.msk [vmem:[#allocation0 + $0x1] ss:$8 sm:$0xf] %vm21_vm0, %v44_v11   ;;  %49 = vst.msk [vmem:[#allocation0 + $0x1] ss:$8 sm:$0xf0] %vm21_vm0, %v44_v11  }
  0x89   :  { %v53_v12 = vld [vmem:[#allocation0] sm:$0x3]  ;;  %v57_v13 = vld [vmem:[#allocation0 + $0x8] sm:$0x3]  ;;  %v62_v14 = vld [vmem:[#allocation0 + $0x10] sm:$0x3] }
  0x8a   :  { %55 = vst [vmem:[%s170_s1] sm:$0x3] %v53_v12  ;;  %108 = vst [vmem:[%s170_s1 + $0x2] sm:$0x3] %v57_v13  ;;  %v68_v15 = vld [vmem:[#allocation0 + $0x18] sm:$0x3] }
  0x8b   :  { %109 = vst [vmem:[%s170_s1 + $0x4] sm:$0x3] %v62_v14  ;;  %v74_v16 = vld [vmem:[#allocation0 + $0x20] sm:$0x3]  ;;  %v80_v17 = vld [vmem:[#allocation0 + $0x28] sm:$0x3] }
  0x8c   :  { %110 = vst [vmem:[%s170_s1 + $0x6] sm:$0x3] %v68_v15  ;;  %111 = vst [vmem:[%s170_s1 + $0x8] sm:$0x3] %v74_v16  ;;  %v86_v18 = vld [vmem:[#allocation0 + $0x30] sm:$0x3] }
  0x8d   :  { %112 = vst [vmem:[%s170_s1 + $0xa] sm:$0x3] %v80_v17  ;;  %v92_v19 = vld [vmem:[#allocation0 + $0x38] sm:$0x3]  ;;  %113 = vst [vmem:[%s170_s1 + $0xc] sm:$0x3] %v86_v18 }
  0x8e   :  { %114 = vst [vmem:[%s170_s1 + $0xe] sm:$0x3] %v92_v19 }

// kernel: run.3
= control target key start
LH: loop header
LB: loop body
LE: loop exit
PB: predicated region body
PF: predicated region fallthrough
CT: control target
= control target key end

     0   :  { %v464_v3 = vmov 0   ;;  %s465_s11 = smov 96   ;;  %vm53_vm0 = vcmask 261120   ;;  %v466_v26 = vmov 0.0|0.0   ;;  %vm467_vm1 = vmmov 0   ;;  %s586_s4 = inlined_call_operand.vmem [shape: f32[32,64], index: 4, kind: input, shape index: {}]   ;;  %s587_s0 = inlined_call_operand.vmem [shape: f32[32,64], index: 0, kind: input, shape index: {}]   ;;  %s588_s1 = inlined_call_operand.vmem [shape: f32[32,64], index: 1, kind: input, shape index: {}]   ;;  %s589_s5 = inlined_call_operand.vmem [shape: f32[32,1], index: 5, kind: input, shape index: {}]   ;;  %s590_s7 = inlined_call_operand.vmem [shape: f32[2,1], index: 7, kind: input, shape index: {}]   ;;  %s591_s6 = inlined_call_operand.vmem [shape: f32[2,32], index: 6, kind: input, shape index: {}]   ;;  %s592_s3 = inlined_call_operand.vmem [shape: f32[2,64], index: 3, kind: input, shape index: {}]   ;;  %s593_s2 = inlined_call_operand.vmem [shape: f32[2,64], index: 2, kind: input, shape index: {}]   ;;  %s594_s8 = inlined_call_operand.vmem [shape: f32[2,64], index: 8, kind: output, shape index: {}]  }
   0x1   :  { %v29_v0 = vld [vmem:[%s586_s4] sm:$0xff]  ;;  %v31_v1 = vld [vmem:[%s586_s4 + $0x10] sm:$0xff]  ;;  %v30_v2 = vld [vmem:[%s586_s4 + $0x8] sm:$0xff]  ;;  %463 = vset.pattern.permute.xlu1 %v464_v3  ;;  %462 = vset.pattern.permute.xlu0 %v464_v3  ;;  %v468_v27 = vmov 0.0   ;;  %vm356_vm3 = vcmask 517120  }
   0x2   :  { %45 = vrot.lane.b32.xlu0 %v29_v0, %s465_s11  ;;  %49 = vrot.lane.b32.xlu1 %v31_v1, %s465_s11  ;;  %v32_v4 = vld [vmem:[%s586_s4 + $0x18] sm:$0xff]  ;;  %v33_v5 = vld [vmem:[%s587_s0] sm:$0xff] }
   0x3   :  { %v34_v6 = vld [vmem:[%s587_s0 + $0x8] sm:$0xff]  ;;  %v37_v7 = vld [vmem:[%s588_s1] sm:$0xff]  ;;  %414 = vmatprep.mubr.msk.f32.mxu0 %vm53_vm0, %v29_v0  ;;  %v35_v11 = vld [vmem:[%s587_s0 + $0x10] sm:$0xff] }
   0x4   :  { %v38_v8 = vld [vmem:[%s588_s1 + $0x8] sm:$0xff]  ;;  %v439_v9 = vpack.c.bf16 %v34_v6, %v33_v5  ;;  %v36_v12 = vld [vmem:[%s587_s0 + $0x18] sm:$0xff]  ;;  %v39_v13 = vld [vmem:[%s588_s1 + $0x10] sm:$0xff] }
   0x5   :  { %v431_v10 = vpack.c.bf16 %v38_v8, %v37_v7  ;;  %v443_v14 = vpack.c.bf16 %v36_v12, %v35_v11  ;;  %v40_v15 = vld [vmem:[%s588_s1 + $0x18] sm:$0xff]  ;;  %v241_v17 = vld [vmem:[%s589_s5 + $0x8] sm:$0xff]  ;;  %v240_v18 = vld [vmem:[%s589_s5] sm:$0xff] }
   0x6   :  { %47 = vrot.lane.b32.xlu0 %v30_v2, %s465_s11  ;;  %51 = vrot.lane.b32.xlu1 %v32_v4, %s465_s11  ;;  %v435_v16 = vpack.c.bf16 %v40_v15, %v39_v13  ;;  %v242_v19 = vld [vmem:[%s589_s5 + $0x10] sm:$0xff]  ;;  %v243_v20 = vld [vmem:[%s589_s5 + $0x18] sm:$0xff] }
   0x7   :  { %440 = vmatprep.subr.bf16.mxu0 %v439_v9  ;;  %432 = vmatprep.subr.bf16.mxu1 %v431_v10  ;;  %v273_v21 = vld [vmem:[%s590_s7] sm:$0x3] }
   0x8   :  { %442 = vmatpush3.bf16.msra.mxu0 %v439_v9  ;;  %434 = vmatpush3.bf16.msra.mxu1 %v431_v10  ;;  %v272_v54 = vld [vmem:[%s591_s6] sm:$0x3] }
   0x9   :  { %444 = vmatprep.subr.bf16.mxu0 %v443_v14  ;;  %436 = vmatprep.subr.bf16.mxu1 %v435_v16  ;;  %v352_v55 = vld [vmem:[%s592_s3] sm:$0x3] }
   0xa   :  { %251 = vperm.xlu1 %463, %v241_v17   ;;  %246 = vperm.xlu0 %462, %v240_v18   ;;  %vm353_vm2 = vcmp.gt.f32.partialorder %v352_v55, 0.0  ;;  %v354_v58 = vld [vmem:[%s593_s2] sm:$0x3] }
   0xc   :  { %446 = vmatpush3.bf16.msra.mxu0 %v443_v14  ;;  %438 = vmatpush3.bf16.msra.mxu1 %v435_v16 }
   0xd   :  { %447 = vmatprep.subr.bf16.mxu1 %v466_v26 }
   0xe   :  { %256 = vperm.xlu1 %463, %v242_v19   ;;  %261 = vperm.xlu0 %462, %v243_v20  }
   0xf   :  { %415 = vmatmul.mubr.msk.f32.vlgmr.msra.gmra.mrb[0].mxu0 %vm53_vm0, %v30_v2 }
  0x10   :  { %417 = vmatprep.mubr.msk.f32.mxu0 %vm53_vm0, %v31_v1 }
  0x12   :  { %276 = vperm.xlu1 %463, %v273_v21  }
  0x13   :  { %418 = vmatmul.mubr.msk.f32.gmra.mrb[2].mxu0 %vm53_vm0, %v32_v4 }
  0x74   :  { %v46_v22 = vpop.permute.xlu0 %45  ;;  %v50_v23 = vpop.permute.xlu1 %49 }
  0x75   :  { %400 = vmatprep.mubr.msk.f32.mxu1 %vm53_vm0, %v46_v22 }
  0x78   :  { %v48_v24 = vpop.permute.xlu0 %47  ;;  %v52_v25 = vpop.permute.xlu1 %51 }
  0x79   :  { %401 = vmatmul.mubr.msk.f32.vlgmr.msra.gmra.mrb[0].mxu1 %vm53_vm0, %v48_v24 }
  0x7a   :  { %403 = vmatprep.mubr.msk.f32.mxu1 %vm53_vm0, %v50_v23 }
  0x7d   :  { %404 = vmatmul.mubr.msk.f32.gmra.mrb[2].mxu1 %vm53_vm0, %v52_v25 }
  0x7e   :  { %428 = vmatprep.mubr.msk.f32.mxu1 %vm467_vm1, %v468_v27 }
  0x89   :  { %v247_v32 = vpop.permute.xlu0 %246  ;;  %v252_v34 = vpop.permute.xlu1 %251 }
  0x8d   :  { %v262_v45 = vpop.permute.xlu0 %261  ;;  %v257_v47 = vpop.permute.xlu1 %256 }
  0x91   :  { %v277_v56 = vpop.permute.xlu1 %276 }
  0xe2   :  { %v416_v28 = vpop.f32.mrb[0].mxu0 }
  0xe3   :  { %v221_v29 = vpop.f32.mrb[1].mxu0 }
  0xe6   :  { %v419_v30 = vpop.f32.mrb[2].mxu0 }
  0xe7   :  { %v231_v31 = vpop.f32.mrb[3].mxu0 }
 0x14c   :  { %v402_v33 = vpop.f32.mrb[0].mxu1 }
 0x14d   :  { %v227_v35 = vadd.f32 %v416_v28, %v402_v33  ;;  %v128_v36 = vpop.f32.mrb[1].mxu1 }
 0x14e   :  { %v222_v37 = vadd.f32 %v221_v29, %v128_v36 }
 0x14f   :  { %v265_v38 = vadd.f32 %v252_v34, %v227_v35 }
 0x150   :  { %v264_v39 = vadd.f32 %v247_v32, %v222_v37  ;;  %v405_v40 = vpop.f32.mrb[2].mxu1 }
 0x151   :  { %v269_v41 = vmax.f32 %v265_v38, 0.0  ;;  %v237_v42 = vadd.f32 %v419_v30, %v405_v40  ;;  %v138_v43 = vpop.f32.mrb[3].mxu1 }
 0x152   :  { %v268_v44 = vmax.f32 %v264_v39, 0.0  ;;  %v232_v46 = vadd.f32 %v231_v31, %v138_v43 }
 0x153   :  { %v267_v48 = vadd.f32 %v262_v45, %v237_v42 }
 0x154   :  { %v448_v49 = vpack.c.bf16 %v269_v41, %v268_v44  ;;  %v266_v50 = vadd.f32 %v257_v47, %v232_v46 }
 0x155   :  { %v271_v51 = vmax.f32 %v267_v48, 0.0 }
 0x156   :  { %v270_v52 = vmax.f32 %v266_v50, 0.0  ;;  %449 = vmatpush3.bf16.msra.mxu1 %v448_v49 }
 0x157   :  { %450 = vmatprep.subr.bf16.mxu1 %v466_v26 }
 0x158   :  { %v451_v53 = vpack.c.bf16 %v271_v51, %v270_v52 }
 0x15a   :  { %452 = vmatpush3.bf16.msra.mxu1 %v451_v53 }
 0x15d   :  { %429 = vmatmul.mubr.msk.f32.vlgmr.msra.gmra.mrb[4].mxu1 %vm53_vm0, %v272_v54 }
 0x230   :  { %v348_v57 = vpop.f32.mrb[4].mxu1 }
 0x231   :  { %v349_v59 = vadd.f32 %v348_v57, %v277_v56  ;;  %v430_v60 = vpop.f32.mrb[5].mxu1 }
 0x233   :  { %v355_v61 = vsel %vm353_vm2, %v354_v58, %v349_v59 }
 0x234   :  { %357 = vst.msk [vmem:[%s594_s8] sm:$0x3] %vm356_vm3, %v355_v61 }

// kernel: run.2
= control target key start
LH: loop header
LB: loop body
LE: loop exit
PB: predicated region body
PF: predicated region fallthrough
CT: control target
= control target key end

     0   :  { %s6449_s0 = inlined_call_operand.vmem [shape: f32[2,4,2,16], index: 0, kind: input, shape index: {}]   ;;  %s6450_s1 = inlined_call_operand.vmem [shape: f32[2,4,2,16], index: 1, kind: input, shape index: {}]   ;;  %s6451_s2 = inlined_call_operand.vmem [shape: f32[2,4,2,16], index: 2, kind: input, shape index: {}]   ;;  %s6452_s3 = inlined_call_operand.vmem [shape: f32[2,4,2,16], index: 3, kind: input, shape index: {}]   ;;  %s6453_s4 = inlined_call_operand.vmem [shape: f32[2,4,16,16], index: 4, kind: input, shape index: {}]   ;;  %s6454_s5 = inlined_call_operand.vmem [shape: f32[4,2,16], index: 5, kind: input, shape index: {}]   ;;  %s6455_s6 = inlined_call_operand.vmem [shape: f32[4,16,16], index: 6, kind: input, shape index: {}]   ;;  %s6456_s7 = inlined_call_operand.vmem [shape: f32[2,16,6], index: 7, kind: input, shape index: {}]   ;;  %s6457_s8 = inlined_call_operand.vmem [shape: f32[2,16,1], index: 8, kind: input, shape index: {}]   ;;  %s6458_s9 = inlined_call_operand.vmem [shape: f32[2,1,32,160], index: 9, kind: input, shape index: {}]   ;;  %s6459_s10 = inlined_call_operand.vmem [shape: f32[2,1,32,1], index: 10, kind: input, shape index: {}]   ;;  %s6460_s11 = inlined_call_operand.vmem [shape: f32[2,1,16,160], index: 11, kind: input, shape index: {}]   ;;  %s6461_s12 = inlined_call_operand.vmem [shape: f32[2,1,16,1], index: 12, kind: input, shape index: {}]   ;;  %s6462_s13 = inlined_call_operand.vmem [shape: f32[2,2,16], index: 13, kind: input, shape index: {}]   ;;  %s6463_s14 = inlined_call_operand.vmem [shape: f32[2,2,1], index: 14, kind: input, shape index: {}]   ;;  %s6464_s15 = inlined_call_operand.vmem [shape: f32[2,16,64], index: 15, kind: input, shape index: {}]   ;;  %s6465_s16 = inlined_call_operand.vmem [shape: f32[2,16,1], index: 16, kind: input, shape index: {}]   ;;  %s6466_s17 = inlined_call_operand.vmem [shape: f32[2,16,32], index: 17, kind: input, shape index: {}]   ;;  %s6467_s18 = inlined_call_operand.vmem [shape: f32[2,16,1], index: 18, kind: input, shape index: {}]   ;;  %s6468_s19 = inlined_call_operand.vmem [shape: f32[2,2,32], index: 19, kind: input, shape index: {}]   ;;  %s6469_s20 = inlined_call_operand.vmem [shape: f32[2,2,1], index: 20, kind: input, shape index: {}]   ;;  %s6470_s21 = inlined_call_operand.vmem [shape: f32[2], index: 21, kind: input, shape index: {}]   ;;  %s6471_s22 = inlined_call_operand.vmem [shape: f32[2,4,2,16], index: 22, kind: output, shape index: {0}]   ;;  %s6472_s23 = inlined_call_operand.vmem [shape: f32[2,4,2,16], index: 23, kind: output, shape index: {1}]   ;;  %s6473_s24 = inlined_call_operand.vmem [shape: f32[2,4,32,16], index: 24, kind: output, shape index: {2}]  }
   0x1   :  { %6487 = sst [smem:[#allocation21_spill]] %s6449_s0 }
   0x2   :  { %6488 = sst [smem:[#allocation22_spill]] %s6450_s1 }
   0x3   :  { %6489 = sst [smem:[#allocation23_spill]] %s6451_s2 }
   0x4   :  { %6490 = sst [smem:[#allocation24_spill]] %s6452_s3 }
   0x5   :  { %6491 = sst [smem:[#allocation25_spill]] %s6453_s4 }
   0x6   :  { %6492 = sst [smem:[#allocation26_spill]] %s6454_s5 }
   0x7   :  { %6493 = sst [smem:[#allocation27_spill]] %s6455_s6 }
   0x8   :  { %6494 = sst [smem:[#allocation28_spill]] %s6456_s7 }
   0x9   :  { %6495 = sst [smem:[#allocation29_spill]] %s6457_s8 }
   0xa   :  { %6496 = sst [smem:[#allocation30_spill]] %s6458_s9 }
   0xb   :  { %6497 = sst [smem:[#allocation31_spill]] %s6459_s10 }
   0xc   :  { %6498 = sst [smem:[#allocation32_spill]] %s6460_s11 }
   0xd   :  { %6499 = sst [smem:[#allocation33_spill]] %s6461_s12 }
   0xe   :  { %6500 = sst [smem:[#allocation34_spill]] %s6462_s13 }
   0xf   :  { %6501 = sst [smem:[#allocation35_spill]] %s6463_s14 }
  0x10   :  { %6502 = sst [smem:[#allocation36_spill]] %s6464_s15 }
  0x11   :  { %6503 = sst [smem:[#allocation37_spill]] %s6465_s16 }
  0x12   :  { %6504 = sst [smem:[#allocation38_spill]] %s6466_s17 }
  0x13   :  { %6505 = sst [smem:[#allocation39_spill]] %s6467_s18 }
  0x14   :  { %6506 = sst [smem:[#allocation40_spill]] %s6468_s19 }
  0x15   :  { %6507 = sst [smem:[#allocation41_spill]] %s6469_s20 }
  0x16   :  { %6508 = sst [smem:[#allocation42_spill]] %s6470_s21 }
  0x17   :  { %6509 = sst [smem:[#allocation43_spill]] %s6471_s22 }
  0x18   :  { %6510 = sst [smem:[#allocation44_spill]] %s6472_s23 }
  0x19   :  { %6511 = sst [smem:[#allocation45_spill]] %s6473_s24 }
  0x1a   :  { %30 = vsyncpa [#allocation5], 0  ;;  %s5814_s5 = smov 0   ;;  %s5816_s26 = smov 0  }
  0x1b   :  { %s5818_s27 = smov 0   ;;  %s5820_s28 = smov 0  }
  0x1c   :  { %s5822_s6 = smov 0  }
  0x1d LB: > { %6512 = sst [smem:[#allocation7_spill]] %s5659_s5  ;;  %s4689_s2 = sadd.s32 4294967295, %s5675_s6   ;;  %s5675_s6 = sphi %s5822_s6, %s36_s6   ;;  %s5671_s28 = sphi %s5820_s28, %s6582_s28   ;;  %s5667_s27 = sphi %s5818_s27, %s6581_s27   ;;  %s5663_s26 = sphi %s5816_s26, %s6580_s26   ;;  %s5659_s5 = sphi %s5814_s5, %s6579_s5  }
  0x1e   : > { %6513 = sst [smem:[#allocation8_spill]] %s5663_s26  ;;  %s45_s29 = sadd.s32 1, %s5667_s27 }
  0x1f   : > { %6514 = sst [smem:[#allocation9_spill]] %s5667_s27  ;;  %p46_p0 = scmp.ge.s32.totalorder %s45_s29, 4 }
  0x20   : > { %6515 = sst [smem:[#allocation10_spill]] %s5671_s28  ;;  %s48_s0 = sadd.s32 1, %s5671_s28 }
  0x21   : > { %6516 = sst [smem:[#allocation11_spill]] %s5675_s6  ;;  %p4691_p1 = scmp.ge.s32.totalorder %s5675_s6, 1 }
  0x22   : > { %p709_p2 = scmp.lt.s32.totalorder %s5675_s6, 9  ;;  %s6584_s29 = smov (%p46_p0, %s45_s29), 0 }
  0x23   : > { %6517 = sst [smem:[#allocation12_spill]] %s6584_s29  ;;  %s6586_s0 = smov (!%p46_p0, %s48_s0), %s5671_s28 }
  0x24   : > { %p5847_p3 = pnand %p4691_p1, %p709_p2  ;;  %p50_p4 = scmp.ge.s32.totalorder %s6586_s0, 2 }
  0x25   : > { %p5851_p5 = scmp.eq.s32.totalorder %s4689_s2, 0  ;;  %s6520_s21 = sld [smem:[#allocation42_spill]] }
  0x26   : > { %p5538_p6 = pneg %p5847_p3  ;;  %s6588_s0 = smov (%p50_p4, %s6586_s0), 0 }
  0x27   : > { %6521 = sst [smem:[#allocation13_spill]] %s6588_s0 }
  0x28   : > { %p5539_p7 = pnand %p5851_p5, %p5538_p6 }
  0x2a   : > { %p5620_p9 = pneg %p5539_p7 }
  0x2b   : > { %s725_s8 = sshll.u32 %s6520_s21, 4  ;;  %s726_s8 = int_to_ptr.vmem [resolvable:$true] %s725_s8 }
  0x2c   : > { %s5618_s4 = scalar_lea.vmem %s726_s8, 16  ;;  %p5626_p12 = scmp.lt.s32.totalorder %s726_s8, %s726_s8 }
  0x2d   : > { %p5619_p8 = scmp.ne.s32.totalorder %s726_s8, %s5618_s4  ;;  %p5627_p13 = scmp.lt.s32.totalorder %s5618_s4, %s5618_s4 }
  0x2f   : > { %p5621_p10 = pnand %p5620_p9, %p5619_p8  ;;  %p5628_p0 = por %p5627_p13, %p5626_p12 }
  0x31   : > { %p5622_p11 = pneg %p5621_p10 }
  0x33   : > { %p5629_p1 = pnand %p5628_p0, %p5622_p11 }
  0x35   : > { %5632 = shalt.err (!%p5629_p1)
}
  0x36   : > { %s5677_s1 = smov [#allocation4]   ;;  %909 = sbr.rel (%p5847_p3) target bundleno = 2971 (0xb9b), region = 108 }
  0x37   : > { %5541 = dma.vmem_to_smem (!%p5539_p7), %s726_s8, 16, %s5677_s1, [#allocation5]  }
  0x3d   : > { %5654 = dma.done.wait (%p5851_p5), [#allocation5], 16  }
  0x3e   : > { %5656 = vsyncadd (%p5851_p5), [#allocation5], 4294967280 }
  0x3f   : > { %915 = sfence }
  0x40   : > { %p1102_p2 = scmp.lt.s32.totalorder %s5663_s26, 1  ;;  %p1104_p4 = scmp.lt.s32.totalorder %s5659_s5, 3 }
  0x41   : > { %s6527_s0 = sld [smem:[#allocation25_spill]]  ;;  %s6529_s23 = sld [smem:[#allocation28_spill]] }
  0x42   : > { %s1103_s2 = scalar_select %p1102_p2, %s5663_s26, 1 }
  0x43   : > { %s5874_s3 = scalar_select %p1104_p4, %s5659_s5, 3 }
  0x44   : > { %s4696_s7 = sshll.u32 %s1103_s2, 2  ;;  %s4705_s25 = sshll.u32 %s1103_s2, 3 }
  0x45   : > { %s1107_s8 = sadd.s32 %s4696_s7, %s5874_s3  ;;  %s4704_s4 = sshll.u32 %s5874_s3, 1 }
  0x46   : > { %s5878_s1 = sshll.u32 %s1107_s8, 1  ;;  %s1140_s30 = sadd.s32 %s4705_s25, %s4704_s4 }
  0x47   : > { %s4706_s17 = sshll.u32 %s1140_s30, 3  ;;  %s6526_s25 = sld [smem:[#allocation26_spill]] }
  0x48   : > { %s5904_s28 = scalar_lea.vmem %s6527_s0, %s4706_s17  ;;  %s4850_s26 = sshll.u32 %s1103_s2, 4 }
  0x49   : > { %6528 = sst [smem:[#allocation14_spill]] %s5904_s28  ;;  %s5909_s22 = scalar_lea.vmem %s6529_s23, %s4850_s26 }
  0x4a   : > { %s6530_s19 = sld [smem:[#allocation29_spill]]  ;;  %s4852_s14 = sshll.u32 %s1103_s2, 6 }
  0x4b   : > { %s4853_s16 = sshll.u32 %s1103_s2, 5  ;;  %s6531_s9 = sld [smem:[#allocation30_spill]] }
  0x4c   : > { %s6532_s10 = sld [smem:[#allocation31_spill]]  ;;  %s6533_s11 = sld [smem:[#allocation32_spill]] }
  0x4d   : > { %s5899_s13 = scalar_lea.vmem %s6526_s25, %s4704_s4  ;;  %s6535_s12 = sld [smem:[#allocation33_spill]] }
  0x4e   : > { %s6537_s15 = sld [smem:[#allocation36_spill]]  ;;  %s6541_s5 = sld [smem:[#allocation37_spill]] }
  0x4f   : > { %s6545_s28 = sld [smem:[#allocation39_spill]]  ;;  %s6548_s0 = sld [smem:[#allocation41_spill]] }
  0x50   : > { %s5914_s30 = scalar_lea.vmem %s6530_s19, %s4850_s26  ;;  %s5936_s19 = sshll.u32 %s1103_s2, 1 }
  0x51   : > { %s5919_s17 = scalar_lea.vmem %s6531_s9, %s4852_s14  ;;  %s6549_s24 = sld [smem:[#allocation43_spill]] }
  0x52   : > { %s5924_s29 = scalar_lea.vmem %s6532_s10, %s4853_s16  ;;  %s5929_s6 = scalar_lea.vmem %s6533_s11, %s4853_s16 }
  0x53   : > { %6534 = sst [smem:[#allocation15_spill]] %s5929_s6  ;;  %s5934_s20 = scalar_lea.vmem %s6535_s12, %s4850_s26 }
  0x54   : > { %6536 = sst [smem:[#allocation16_spill]] %s5934_s20  ;;  %s5941_s8 = scalar_lea.vmem %s6537_s15, %s4850_s26 }
  0x55   : > { %6538 = sst [smem:[#allocation17_spill]] %s5941_s8  ;;  %s5954_s9 = scalar_lea.vmem %s6541_s5, %s4850_s26 }
  0x56   : > { %6542 = sst [smem:[#allocation18_spill]] %s5954_s9  ;;  %s6543_s10 = sld [smem:[#allocation38_spill]] }
  0x57   : > { %s5964_s8 = scalar_lea.vmem %s6545_s28, %s4850_s26  ;;  %s6547_s16 = sld [smem:[#allocation40_spill]] }
  0x58   : > { %6546 = sst [smem:[#allocation20_spill]] %s5964_s8  ;;  %s1212_s18 = scalar_lea.vmem %s6548_s0, %s5936_s19 }
  0x59   : > { %s1220_s9 = scalar_lea.vmem %s6549_s24, %s5878_s1  ;;  %s6550_s14 = sld [smem:[#allocation44_spill]] }
  0x5a   : > { %s4736_s20 = sshll.u32 %s5874_s3, 2  ;;  %s6551_s6 = sld [smem:[#allocation45_spill]] }
  0x5b   : > { %s1235_s12 = sadd.s32 %s4850_s26, %s4736_s20  ;;  %s6552_s21 = sld [smem:[#allocation7_spill]] }
  0x5c   : > { %s5959_s11 = scalar_lea.vmem %s6543_s10, %s4850_s26  ;;  %s4738_s15 = sshll.u32 %s1235_s12, 3 }
  0x5d   : > { %6544 = sst [smem:[#allocation19_spill]] %s5959_s11  ;;  %s1208_s7 = scalar_lea.vmem %s6547_s16, %s5936_s19 }
  0x5f   : > { %s1228_s11 = scalar_lea.vmem %s6550_s14, %s5878_s1 }
  0x60   : > { %s5986_s25 = scalar_lea.vmem %s6551_s6, %s4738_s15 }
  0x61   : > { %p4739_p3 = scmp.ne.s32.totalorder %s6552_s21, 0 }
  0x62   : > { %vm1242_vm0 = vcmask (!%p4739_p3), 130048   ;;  %vm1245_vm1 = vcmask (!%p4739_p3), 123904   ;;  %v5678_v0 = vmov (!%p4739_p3), 0.0  }
  0x63   : > { %1241 = sbr.rel (%p4739_p3) target bundleno = 106 (0x6a), region = 116  ;;  %1243 = vst.msk [vmem:[#allocation2] sm:$0xff] (!%p4739_p3), %vm1242_vm0, %v5678_v0  ;;  %1244 = vst.msk [vmem:[#allocation2 + $0x8] sm:$0xff] (!%p4739_p3), %vm1242_vm0, %v5678_v0 }
  0x64   : > { %1246 = vst.msk [vmem:[#allocation3] sm:$0x3] (!%p4739_p3), %vm1245_vm1, %v5678_v0 }
  0x6a PF: > { %v5990_v1 = vld [vmem:[%s5909_s22] sm:$0xff]  ;;  %vm1272_vm2 = vcmask 1041408   ;;  %s5679_s3 = smov 126   ;;  %s5680_s26 = smov 124   ;;  %v6001_v5 = vld [vmem:[%s5909_s22 + $0x8] sm:$0xff]  ;;  %v5681_v8 = vmov 0  }
  0x6b   : > { %1263 = vrot.lane.b32.xlu0 %v5990_v1, %s5679_s3  ;;  %1433 = vrot.lane.b32.xlu1 %v5990_v1, %s5680_s26  ;;  %s6553_s8 = sld [smem:[#allocation22_spill]]  ;;  %v1253_v3 = vld [vmem:[%s5899_s13] sm:$0x3]  ;;  %v1259_v4 = vld [vmem:[#allocation3] sm:$0x3]  ;;  %s6555_s27 = sld [smem:[#allocation21_spill]] }
  0x6c   : > { %5044 = vmatprep.subr.msk.mxu1 %vm1272_vm2, %v1253_v3  ;;  %5597 = vset.pattern.permute.xlu1 %v5681_v8  ;;  %v1257_v9 = vld [vmem:[%s5914_s30 + $0x8] sm:$0xff]  ;;  %v1256_v10 = vld [vmem:[%s5914_s30] sm:$0xff]  ;;  %v6024_v12 = vld [vmem:[%s5919_s17 + $0x10] sm:$0xff]  ;;  %s5682_s13 = smov 96   ;;  %s6557_s22 = sld [smem:[#allocation15_spill]]  ;;  %vm1267_vm4 = vcmask 15360  }
  0x6d   : > { %5045 = vmatpush3.msk.msra.mxu1 %vm1272_vm2, %v1253_v3  ;;  %5596 = vset.pattern.permute.xlu0 %v5681_v8  ;;  %v6021_v11 = vld [vmem:[%s5919_s17] sm:$0xff]  ;;  %v6034_v14 = vld [vmem:[%s5919_s17 + $0x30] sm:$0xff]  ;;  %s5683_s30 = smov 64   ;;  %s5684_s5 = smov 32   ;;  %v1910_v16 = vld [vmem:[%s5924_s29 + $0x8] sm:$0xff]  ;;  %vm1539_vm5 = vcmask 130048  }
  0x6e   : > { %v6031_v13 = vld [vmem:[%s5919_s17 + $0x20] sm:$0xff]  ;;  %s6558_s2 = sld [smem:[#allocation16_spill]]  ;;  %s6559_s4 = sld [smem:[#allocation17_spill]]  ;;  %v1911_v19 = vld [vmem:[%s5924_s29 + $0x10] sm:$0xff]  ;;  %v1912_v20 = vld [vmem:[%s5924_s29 + $0x18] sm:$0xff]  ;;  %vm1913_vm6 = vcmask 261120  }
  0x6f   : > { %1265 = vrot.lane.b32.xlu0 %v6001_v5, %s5679_s3  ;;  %1435 = vrot.lane.b32.xlu1 %v6001_v5, %s5680_s26  ;;  %v1909_v15 = vld [vmem:[%s5924_s29] sm:$0xff]  ;;  %s6560_s10 = sld [smem:[#allocation18_spill]]  ;;  %s6561_s14 = sld [smem:[#allocation19_spill]]  ;;  %vm5687_vm7 = vmmov 0   ;;  %vm4227_vm8 = vcmask 123904  }
  0x70   : > { %s6562_s12 = sld [smem:[#allocation20_spill]]  ;;  %s5685_s29 = smov 112   ;;  %v4220_v32 = vld [vmem:[%s1212_s18] sm:$0x3] }
  0x71   : > { %s6554_s0 = scalar_lea.vmem %s6553_s8, %s5878_s1  ;;  %s6556_s23 = scalar_lea.vmem %s6555_s27, %s5878_s1  ;;  %v6176_v63 = vld [vmem:[#allocation2] sm:$0xff] }
  0x72   : > { %v1248_v2 = vld [vmem:[%s6554_s0] sm:$0x3]  ;;  %v6054_v18 = vld [vmem:[%s6557_s22 + $0x10] sm:$0xff]  ;;  %s6563_s21 = sld [smem:[#allocation35_spill]]  ;;  %s6570_s18 = sld [smem:[#allocation34_spill]] }
  0x73   : > { %vm1258_vm3 = vcmp.gt.f32.partialorder %v1248_v2, 0.0  ;;  %5034 = vmatprep.subr.msk.mxu0 %vm1272_vm2, %v1248_v2  ;;  %v1247_v6 = vld [vmem:[%s6556_s23] sm:$0x3]  ;;  %1528 = vperm.xlu1 %5597, %v1257_v9   ;;  %s6566_s0 = sld [smem:[#allocation27_spill]]  ;;  %s6572_s27 = sld [smem:[#allocation23_spill]] }
  0x74   : > { %5035 = vmatpush3.msk.msra.mxu0 %vm1272_vm2, %v1248_v2  ;;  %v6011_v7 = vsel %vm1258_vm3, %v1247_v6, %v1259_v4  ;;  %1523 = vperm.xlu0 %5596, %v1256_v10   ;;  %v6051_v17 = vld [vmem:[%s6557_s22] sm:$0xff]  ;;  %v2828_v22 = vld [vmem:[%s6558_s2 + $0x8] sm:$0xff] }
  0x75   : > { %5039 = vmatprep.subr.msk.mxu0 %vm1272_vm2, %v6011_v7  ;;  %v2827_v21 = vld [vmem:[%s6558_s2] sm:$0xff]  ;;  %v6079_v25 = vld [vmem:[%s6559_s4 + $0x8] sm:$0xff] }
  0x76   : > { %v6074_v24 = vld [vmem:[%s6559_s4] sm:$0xff]  ;;  %v3519_v27 = vld [vmem:[%s6560_s10 + $0x8] sm:$0xff]  ;;  %s6567_s4 = sld [smem:[#allocation14_spill]] }
  0x77   : > { %2035 = vrot.lane.b32.xlu1 %v6021_v11, %s5682_s13  ;;  %v3518_v26 = vld [vmem:[%s6560_s10] sm:$0xff]  ;;  %v6091_v29 = vld [vmem:[%s6561_s14 + $0x8] sm:$0xff]  ;;  %s6576_s10 = sld [smem:[#allocation8_spill]] }
  0x78   : > { %2037 = vrot.lane.b32.xlu0 %v6024_v12, %s5682_s13  ;;  %s6564_s3 = scalar_lea.vmem %s6563_s21, %s5936_s19  ;;  %v6086_v28 = vld [vmem:[%s6561_s14] sm:$0xff]  ;;  %v4051_v31 = vld [vmem:[%s6562_s12 + $0x8] sm:$0xff]  ;;  %s6571_s8 = scalar_lea.vmem %s6570_s18, %s5936_s19 }
  0x79   : > { %v3273_v23 = vld [vmem:[%s6564_s3] sm:$0x3]  ;;  %v1538_v38 = vld [vmem:[%s6566_s0 + $0x8] sm:$0xff]  ;;  %v4753_v40 = vld [vmem:[%s6566_s0 + $0x10] sm:$0xff]  ;;  %s6568_s3 = sld [smem:[#allocation24_spill]]  ;;  %s6573_s23 = scalar_lea.vmem %s6572_s27, %s5878_s1 }
  0x7a   : > { %v4050_v30 = vld [vmem:[%s6562_s12] sm:$0xff]  ;;  %v4754_v41 = vld [vmem:[%s6566_s0 + $0x18] sm:$0xff]  ;;  %v4760_v44 = vld [vmem:[%s6566_s0 + $0x28] sm:$0xff] }
  0x7b   : > { %2039 = vrot.lane.b32.xlu1 %v6031_v13, %s5682_s13  ;;  %v1537_v37 = vld [vmem:[%s6566_s0] sm:$0xff]  ;;  %v5345_v42 = vpack.c.bf16 %v4754_v41, %v4753_v40  ;;  %v4765_v46 = vld [vmem:[%s6566_s0 + $0x30] sm:$0xff]  ;;  %v4766_v47 = vld [vmem:[%s6566_s0 + $0x38] sm:$0xff] }
  0x7c   : > { %2041 = vrot.lane.b32.xlu0 %v6034_v14, %s5682_s13  ;;  %v6124_v39 = vpack.c.bf16 %v1538_v38, %v1537_v37  ;;  %v4759_v43 = vld [vmem:[%s6566_s0 + $0x20] sm:$0xff]  ;;  %v6149_v48 = vpack.c.bf16 %v4766_v47, %v4765_v46  ;;  %v6160_v55 = vld [vmem:[%s6567_s4 + $0x8] sm:$0xff] }
  0x7d   : > { %v6140_v45 = vpack.c.bf16 %v4760_v44, %v4759_v43  ;;  %v6167_v59 = vld [vmem:[%s6567_s4] sm:$0xff]  ;;  %v6193_v2 = vld [vmem:[#allocation2 + $0x8] sm:$0xff]  ;;  %s4064_s19 = sld [smem:[#allocation4 + %s6576_s10]] }
  0x7e   : > { %5342 = vmatprep.subr.bf16.mxu1 %v6124_v39  ;;  %v5361_v3 = vpack.c.bf16 %v6193_v2, %v6176_v63 }
  0x7f   : > { %2140 = vrot.lane.b32.xlu1 %v6021_v11, %s5683_s30  ;;  %s6569_s26 = scalar_lea.vmem %s6568_s3, %s5878_s1 }
  0x80   : > { %2142 = vrot.lane.b32.xlu0 %v6024_v12, %s5683_s30 }
  0x83   : > { %2144 = vrot.lane.b32.xlu1 %v6031_v13, %s5683_s30 }
  0x84   : > { %2146 = vrot.lane.b32.xlu0 %v6034_v14, %s5683_s30 }
  0x87   : > { %2245 = vrot.lane.b32.xlu1 %v6021_v11, %s5684_s5 }
  0x88   : > { %2247 = vrot.lane.b32.xlu0 %v6024_v12, %s5684_s5 }
  0x8b   : > { %2249 = vrot.lane.b32.xlu1 %v6031_v13, %s5684_s5 }
  0x8c   : > { %2251 = vrot.lane.b32.xlu0 %v6034_v14, %s5684_s5 }
  0x8f   : > { %2013 = vperm.xlu1 %5597, %v1909_v15  }
  0x90   : > { %2018 = vperm.xlu0 %5596, %v1910_v16  }
  0x93   : > { %2922 = vrot.lane.b32.xlu1 %v6051_v17, %s5682_s13 }
  0x94   : > { %2924 = vrot.lane.b32.xlu0 %v6054_v18, %s5682_s13 }
  0x97   : > { %3007 = vrot.lane.b32.xlu1 %v6051_v17, %s5683_s30 }
  0x98   : > { %3009 = vrot.lane.b32.xlu0 %v6054_v18, %s5683_s30 }
  0x9b   : > { %3092 = vrot.lane.b32.xlu1 %v6051_v17, %s5684_s5 }
  0x9c   : > { %3094 = vrot.lane.b32.xlu0 %v6054_v18, %s5684_s5 }
  0x9f   : > { %2023 = vperm.xlu1 %5597, %v1911_v19  }
  0xa0   : > { %2028 = vperm.xlu0 %5596, %v1912_v20  }
  0xa3   : > { %2912 = vperm.xlu1 %5597, %v2827_v21  }
  0xa4   : > { %2917 = vperm.xlu0 %5596, %v2828_v22  }
  0xa7   : > { %3276 = vperm.xlu1 %5597, %v3273_v23  }
  0xa8   : > { %3799 = vrot.lane.b32.xlu0 %v6074_v24, %s5682_s13 }
  0xab   : > { %3801 = vrot.lane.b32.xlu1 %v6079_v25, %s5682_s13 }
  0xac   : > { %3702 = vperm.xlu0 %5596, %v3518_v26  }
  0xaf   : > { %3707 = vperm.xlu1 %5597, %v3519_v27  }
  0xb0   : > { %3888 = vrot.lane.b32.xlu0 %v6086_v28, %s5685_s29 }
  0xb3   : > { %3890 = vrot.lane.b32.xlu1 %v6091_v29, %s5685_s29 }
  0xb4   : > { %4054 = vperm.xlu0 %5596, %v4050_v30  }
  0xb7   : > { %4059 = vperm.xlu1 %5597, %v4051_v31  }
  0xbb   : > { %4223 = vperm.xlu1 %5597, %v4220_v32  }
  0xdd   : > { %v6102_v33 = vpop.permute.xlu0 %1263  ;;  %v1434_v34 = vpop.permute.xlu1 %1433 }
  0xde   : > { %5036 = vmatprep.mubr.msk.f32.mxu0 %vm1267_vm4, %v6102_v33  ;;  %5046 = vmatprep.mubr.msk.f32.mxu1 %vm1267_vm4, %v1434_v34 }
  0xe1   : > { %v6107_v35 = vpop.permute.xlu0 %1265  ;;  %v1436_v36 = vpop.permute.xlu1 %1435 }
  0xe2   : > { %5037 = vmatmul.mubr.msk.f32.vlgmr.msra.gmra.mrb[0].mxu0 %vm1267_vm4, %v6107_v35  ;;  %5047 = vmatmul.mubr.msk.f32.vlgmr.msra.gmra.mrb[0].mxu1 %vm1267_vm4, %v1436_v36 }
  0xe3   : > { %5040 = vmatpush3.msk.msra.mxu0 %vm1272_vm2, %v6011_v7  ;;  %5041 = vmatprep.mubr.msk.f32.mxu0 %vm1267_vm4, %v5990_v1 }
  0xe4   : > { %5344 = vmatpush3.bf16.msra.mxu1 %v6124_v39  ;;  %5346 = vmatprep.subr.bf16.mxu0 %v5345_v42 }
  0xe5   : > { %5350 = vmatprep.subr.bf16.mxu1 %v6140_v45 }
  0xea   : > { %5042 = vmatmul.mubr.msk.f32.vlgmr.msra.gmra.mrb[0].mxu0 %vm1267_vm4, %v6001_v5 }
  0xeb   : > { %5348 = vmatpush3.bf16.msra.mxu0 %v5345_v42 }
  0xec   : > { %5354 = vmatprep.subr.bf16.mxu0 %v6149_v48 }
  0xf2   : > { %v6157_v54 = vpop.permute.xlu1 %1528 }
  0xf3   : > { %v6163_v57 = vpop.permute.xlu0 %1523 }
  0xf6   : > { %v2036_v4 = vpop.permute.xlu1 %2035 }
  0xf7   : > { %v2038_v6 = vpop.permute.xlu0 %2037 }
  0xfb   : > { %v2042_v19 = vpop.permute.xlu0 %2041 }
  0xff   : > { %v2143_v36 = vpop.permute.xlu0 %2142 }
 0x1b5   : > { %v6152_v49 = vpop.f32.mrb[0].mxu1 }
 0x1b6   : > { %v6154_v50 = vpop.f32.mrb[1].mxu1 }
 0x1bd   : > { %v5043_v51 = vpop.f32.mrb[0].mxu0 }
 0x1be   : > { %v1520_v52 = vadd.f32 %v6152_v49, %v5043_v51  ;;  %v1424_v53 = vpop.f32.mrb[1].mxu0 }
 0x1bf   : > { %v1519_v56 = vadd.f32 %v6154_v50, %v1424_v53 }
 0x1c0   : > { %v1532_v58 = vadd.f32 %v6157_v54, %v1520_v52  ;;  %v2147_v52 = vpop.permute.xlu0 %2146 }
 0x1c1   : > { %v1531_v60 = vadd.f32 %v6163_v57, %v1519_v56 }
 0x1c2   : > { %v6171_v61 = vadd.f32 %v1532_v58, %v6160_v55 }
 0x1c3   : > { %v6174_v62 = vadd.f32 %v1531_v60, %v6167_v59  ;;  %v1902_v60 = vld [vmem:[%s5919_s17 + $0x8] sm:$0xff] }
 0x1c4   : > { %v2248_v56 = vpop.permute.xlu0 %2247 }
 0x1c5   : > { %5053 = vmatprep.mubr.msk.f32.mxu1 %vm1539_vm5, %v6174_v62  ;;  %5063 = vmatprep.mubr.msk.f32.mxu0 %vm1539_vm5, %v6174_v62  ;;  %v6184_v0 = vpack.c.bf16 %v6171_v61, %v6174_v62 }
 0x1c6   : > { %5054 = vmatmul.mubr.msk.f32.vlgmr.msra.gmra.mrb[2].mxu1 %vm1539_vm5, %v6171_v61  ;;  %5064 = vmatmul.mubr.msk.f32.vlgmr.msra.gmra.mrb[2].mxu0 %vm1539_vm5, %v6171_v61 }
 0x1c7   : > { %5352 = vmatpush3.bf16.msra.mxu1 %v6140_v45  ;;  %5056 = vmatprep.mubr.msk.f32.mxu1 %vm1539_vm5, %v6176_v63 }
 0x1c8   : > { %5358 = vmatprep.subr.bf16.mxu1 %v6184_v0  ;;  %5066 = vmatprep.mubr.msk.f32.mxu0 %vm1539_vm5, %v6176_v63 }
 0x1c9   : > { %5356 = vmatpush3.bf16.msra.mxu0 %v6149_v48 }
 0x1ca   : > { %5057 = vmatmul.mubr.msk.f32.gmra.mrb[4].mxu1 %vm1539_vm5, %v6193_v2  ;;  %5067 = vmatmul.mubr.msk.f32.gmra.mrb[4].mxu0 %vm1539_vm5, %v6193_v2 }
 0x1cb   : > { %5073 = vmatprep.mubr.msk.f32.mxu1 %vm1539_vm5, %v6174_v62  ;;  %5083 = vmatprep.mubr.msk.f32.mxu0 %vm1539_vm5, %v6174_v62 }
 0x1cc   : > { %5398 = vmatprep.subr.bf16.mxu0 %v6124_v39 }
 0x1ce   : > { %5074 = vmatmul.mubr.msk.f32.vlgmr.msra.gmra.mrb[6].mxu1 %vm1539_vm5, %v6171_v61  ;;  %5084 = vmatmul.mubr.msk.f32.vlgmr.msra.gmra.mrb[6].mxu0 %vm1539_vm5, %v6171_v61 }
 0x1cf   : > { %5360 = vmatpush3.bf16.msra.mxu1 %v6184_v0  ;;  %5086 = vmatprep.mubr.msk.f32.mxu0 %vm1539_vm5, %v6176_v63 }
 0x1d0   : > { %5400 = vmatpush3.bf16.msra.mxu0 %v6124_v39  ;;  %5076 = vmatprep.mubr.msk.f32.mxu1 %vm1539_vm5, %v6176_v63 }
 0x1d1   : > { %5402 = vmatprep.subr.bf16.mxu0 %v5345_v42  ;;  %5362 = vmatprep.subr.bf16.mxu1 %v5361_v3 }
 0x1d2   : > { %5087 = vmatmul.mubr.msk.f32.gmra.mrb[8].mxu0 %vm1539_vm5, %v6193_v2  ;;  %5077 = vmatmul.mubr.msk.f32.gmra.mrb[8].mxu1 %vm1539_vm5, %v6193_v2 }
 0x1d3   : > { %5163 = vmatprep.mubr.msk.f32.mxu0 %vm1539_vm5, %v6174_v62  ;;  %5364 = vmatpush3.bf16.msra.mxu1 %v5361_v3  ;;  %v2252_v3 = vpop.permute.xlu0 %2251 }
 0x1d4   : > { %5097 = vmatprep.mubr.msk.f32.mxu1 %vm1913_vm6, %v6021_v11  ;;  %v2040_v11 = vpop.permute.xlu1 %2039 }
 0x1d6   : > { %5164 = vmatmul.mubr.msk.f32.vlgmr.msra.gmra.mrb[10].mxu0 %vm1539_vm5, %v6171_v61  ;;  %5098 = vmatmul.mubr.msk.f32.vlgmr.msra.gmra.mrb[10].mxu1 %vm1913_vm6, %v6024_v12 }
 0x1d7   : > { %5404 = vmatpush3.bf16.msra.mxu0 %v5345_v42  ;;  %5100 = vmatprep.mubr.msk.f32.mxu1 %vm1913_vm6, %v6031_v13 }
 0x1d8   : > { %5406 = vmatprep.subr.bf16.mxu0 %v6140_v45  ;;  %v2141_v31 = vpop.permute.xlu1 %2140 }
 0x1da   : > { %5101 = vmatmul.mubr.msk.f32.gmra.mrb[12].mxu1 %vm1913_vm6, %v6034_v14 }
 0x1db   : > { %5111 = vmatprep.mubr.msk.f32.mxu1 %vm1913_vm6, %v2036_v4  ;;  %v1904_v4 = vld [vmem:[%s5919_s17 + $0x18] sm:$0xff] }
 0x1dc   : > { %v2145_v44 = vpop.permute.xlu1 %2144 }
 0x1e0   : > { %v2246_v53 = vpop.permute.xlu1 %2245 }
 0x1e4   : > { %v2250_v58 = vpop.permute.xlu1 %2249 }
 0x299   : > { %v5055_v7 = vpop.f32.mrb[2].mxu1  ;;  %v5065_v8 = vpop.f32.mrb[2].mxu0 }
 0x29a   : > { %v1618_v9 = vpop.f32.mrb[3].mxu1  ;;  %v1706_v10 = vpop.f32.mrb[3].mxu0 }
 0x29b   : > { %v5365_v15 = vpack.c.bf16 %v5055_v7, %v1618_v9  ;;  %v5373_v16 = vpack.c.bf16 %v5065_v8, %v1706_v10  ;;  %v1908_v7 = vld [vmem:[%s5919_s17 + $0x38] sm:$0xff]  ;;  %v2019_v8 = vpop.permute.xlu0 %2018  ;;  %v2014_v10 = vpop.permute.xlu1 %2013 }
 0x29d   : > { %v5058_v20 = vpop.f32.mrb[4].mxu1  ;;  %5366 = vmatprep.subr.bf16.mxu1 %v5365_v15  ;;  %v5068_v12 = vpop.f32.mrb[4].mxu0 }
 0x29e   : > { %v1628_v21 = vpop.f32.mrb[5].mxu1  ;;  %5368 = vmatpush3.bf16.msra.mxu1 %v5365_v15  ;;  %v1716_v13 = vpop.f32.mrb[5].mxu0 }
 0x29f   : > { %v5369_v22 = vpack.c.bf16 %v5058_v20, %v1628_v21  ;;  %v5377_v23 = vpack.c.bf16 %v5068_v12, %v1716_v13 }
 0x2a1   : > { %v5075_v14 = vpop.f32.mrb[6].mxu1  ;;  %v5085_v26 = vpop.f32.mrb[6].mxu0  ;;  %5370 = vmatprep.subr.bf16.mxu1 %v5369_v22 }
 0x2a2   : > { %v1794_v27 = vpop.f32.mrb[7].mxu1  ;;  %v1882_v30 = vpop.f32.mrb[7].mxu0  ;;  %5372 = vmatpush3.bf16.msra.mxu1 %v5369_v22 }
 0x2a3   : > { %v5381_v32 = vpack.c.bf16 %v5075_v14, %v1794_v27  ;;  %v5389_v34 = vpack.c.bf16 %v5085_v26, %v1882_v30  ;;  %5374 = vmatprep.subr.bf16.mxu1 %v5373_v16 }
 0x2a5   : > { %5112 = vmatmul.mubr.msk.f32.vlgmr.msra.gmra.mrb[10].mxu1 %vm1913_vm6, %v2038_v6  ;;  %v5088_v37 = vpop.f32.mrb[8].mxu0  ;;  %v5078_v38 = vpop.f32.mrb[8].mxu1  ;;  %v1906_v6 = vld [vmem:[%s5919_s17 + $0x28] sm:$0xff] }
 0x2a6   : > { %5376 = vmatpush3.bf16.msra.mxu1 %v5373_v16  ;;  %v1892_v40 = vpop.f32.mrb[9].mxu0  ;;  %5114 = vmatprep.mubr.msk.f32.mxu1 %vm1913_vm6, %v2040_v11  ;;  %v1804_v41 = vpop.f32.mrb[9].mxu1 }
 0x2a7   : > { %v5393_v42 = vpack.c.bf16 %v5088_v37, %v1892_v40  ;;  %5378 = vmatprep.subr.bf16.mxu1 %v5377_v23  ;;  %v5385_v43 = vpack.c.bf16 %v5078_v38, %v1804_v41 }
 0x2a9   : > { %5115 = vmatmul.mubr.msk.f32.gmra.mrb[12].mxu1 %vm1913_vm6, %v2042_v19  ;;  %v5165_v46 = vpop.f32.mrb[10].mxu0 }
 0x2aa   : > { %5380 = vmatpush3.bf16.msra.mxu1 %v5377_v23  ;;  %v2549_v47 = vpop.f32.mrb[11].mxu0  ;;  %5125 = vmatprep.mubr.msk.f32.mxu1 %vm1913_vm6, %v2141_v31 }
 0x2ab   : > { %v6242_v51 = vpack.c.bf16 %v5165_v46, %v2549_v47  ;;  %5382 = vmatprep.subr.bf16.mxu1 %v5381_v32 }
 0x2ad   : > { %5126 = vmatmul.mubr.msk.f32.vlgmr.msra.gmra.mrb[10].mxu1 %vm1913_vm6, %v2143_v36 }
 0x2ae   : > { %5384 = vmatpush3.bf16.msra.mxu1 %v5381_v32  ;;  %5128 = vmatprep.mubr.msk.f32.mxu1 %vm1913_vm6, %v2145_v44 }
 0x2af   : > { %5386 = vmatprep.subr.bf16.mxu1 %v5385_v43 }
 0x2b1   : > { %5129 = vmatmul.mubr.msk.f32.gmra.mrb[12].mxu1 %vm1913_vm6, %v2147_v52 }
 0x2b2   : > { %5388 = vmatpush3.bf16.msra.mxu1 %v5385_v43  ;;  %5139 = vmatprep.mubr.msk.f32.mxu1 %vm1913_vm6, %v2246_v53 }
 0x2b3   : > { %5390 = vmatprep.subr.bf16.mxu1 %v5389_v34 }
 0x2b5   : > { %5140 = vmatmul.mubr.msk.f32.vlgmr.msra.gmra.mrb[10].mxu1 %vm1913_vm6, %v2248_v56 }
 0x2b6   : > { %5392 = vmatpush3.bf16.msra.mxu1 %v5389_v34  ;;  %5142 = vmatprep.mubr.msk.f32.mxu1 %vm1913_vm6, %v2250_v58 }
 0x2b7   : > { %5394 = vmatprep.subr.bf16.mxu1 %v5393_v42 }
 0x2b9   : > { %5143 = vmatmul.mubr.msk.f32.gmra.mrb[12].mxu1 %vm1913_vm6, %v2252_v3 }
 0x2ba   : > { %5396 = vmatpush3.bf16.msra.mxu1 %v5393_v42  ;;  %5153 = vmatprep.mubr.msk.f32.mxu1 %vm1913_vm6, %v1902_v60 }
 0x2bd   : > { %5154 = vmatmul.mubr.msk.f32.vlgmr.msra.gmra.mrb[10].mxu1 %vm1913_vm6, %v1904_v4 }
 0x2be   : > { %5156 = vmatprep.mubr.msk.f32.mxu1 %vm1913_vm6, %v1906_v6 }
 0x2c1   : > { %5157 = vmatmul.mubr.msk.f32.gmra.mrb[12].mxu1 %vm1913_vm6, %v1908_v7 }
 0x390   : > { %v5155_v9 = vpop.f32.mrb[10].mxu1 }
 0x391   : > { %v5494_v15 = vadd.f32 %v5155_v9, %v2019_v8  ;;  %v2428_v16 = vpop.f32.mrb[11].mxu1  ;;  %v2824_v8 = vld [vmem:[%s6557_s22 + $0x8] sm:$0xff] }
 0x392   : > { %v5495_v11 = vadd.f32 %v2428_v16, %v2014_v10 }
 0x393   : > { %v4792_v19 = vmul.f32 -1.442695, %v5494_v15 }
 0x394   : > { %v4791_v20 = vmul.f32 -1.442695, %v5495_v11  ;;  %v6259_v12 = vpop.f32.mrb[12].mxu1  ;;  %v2826_v11 = vld [vmem:[%s6557_s22 + $0x18] sm:$0xff] }
 0x395   : > { %5598 = vpow2.f32 %v4792_v19  ;;  %v6261_v21 = vpop.f32.mrb[13].mxu1 }
 0x396   : > { %5600 = vpow2.f32 %v4791_v20  ;;  %v5686_v20 = vmov 0.0|0.0  }
 0x397   : > { %5453 = vmatprep.subr.bf16.mxu1 %v5686_v20 }
 0x39f   : > { %v5599_v13 = vpop.eup %5598 }
 0x3a0   : > { %v5601_v22 = vpop.eup %5600  ;;  %v2458_v23 = vadd.f32 1.0, %v5599_v13  ;;  %v5688_v13 = vmov 0.0  }
 0x3a1   : > { %v2457_v14 = vadd.f32 1.0, %v5601_v22  ;;  %5258 = vmatprep.mubr.msk.f32.mxu1 %vm5687_vm7, %v5688_v13 }
 0x3a2   : > { %5602 = vrcp.f32 %v2458_v23 }
 0x3a3   : > { %5604 = vrcp.f32 %v2457_v14 }
 0x3ac   : > { %v5603_v26 = vpop.eup %5602 }
 0x3ad   : > { %v5605_v27 = vpop.eup %5604  ;;  %v2476_v30 = vmul.f32 %v5603_v26, %v6193_v2 }
 0x3ae   : > { %v2475_v31 = vmul.f32 %v5605_v27, %v6176_v63 }
 0x3b0   : > { %5166 = vmatprep.mubr.msk.f32.mxu0 %vm1539_vm5, %v2475_v31  ;;  %v5417_v32 = vpack.c.bf16 %v2476_v30, %v2475_v31 }
 0x3b1   : > { %5167 = vmatmul.mubr.msk.f32.gmra.mrb[12].mxu0 %vm1539_vm5, %v2476_v30 }
 0x3b2   : > { %5173 = vmatprep.mubr.msk.f32.mxu0 %vm1539_vm5, %v6174_v62 }
 0x3b5   : > { %5174 = vmatmul.mubr.msk.f32.vlgmr.msra.gmra.mrb[14].mxu0 %vm1539_vm5, %v6171_v61 }
 0x3b6   : > { %5176 = vmatprep.mubr.msk.f32.mxu0 %vm1539_vm5, %v2475_v31  ;;  %5408 = vmatpush3.bf16.msra.mxu0 %v6140_v45 }
 0x3b7   : > { %5410 = vmatprep.subr.bf16.mxu0 %v6149_v48 }
 0x3b9   : > { %5177 = vmatmul.mubr.msk.f32.gmra.mrb[16].mxu0 %vm1539_vm5, %v2476_v30 }
 0x3ba   : > { %5183 = vmatprep.mubr.msk.f32.mxu0 %vm1539_vm5, %v6174_v62 }
 0x3bd   : > { %5184 = vmatmul.mubr.msk.f32.vlgmr.msra.gmra.mrb[18].mxu0 %vm1539_vm5, %v6171_v61 }
 0x3be   : > { %5412 = vmatpush3.bf16.msra.mxu0 %v6149_v48  ;;  %5186 = vmatprep.mubr.msk.f32.mxu0 %vm1539_vm5, %v2475_v31  ;;  %v2923_v48 = vpop.permute.xlu1 %2922 }
 0x3bf   : > { %5414 = vmatprep.subr.bf16.mxu0 %v6184_v0 }
 0x3c1   : > { %5187 = vmatmul.mubr.msk.f32.gmra.mrb[20].mxu0 %vm1539_vm5, %v2476_v30 }
 0x3c2   : > { %5193 = vmatprep.mubr.msk.f32.mxu0 %vm1539_vm5, %v6174_v62  ;;  %v3008_v41 = vpop.permute.xlu1 %3007 }
 0x3c5   : > { %5194 = vmatmul.mubr.msk.f32.vlgmr.msra.gmra.mrb[22].mxu0 %vm1539_vm5, %v6171_v61  ;;  %v2925_v61 = vpop.permute.xlu0 %2924 }
 0x3c6   : > { %5416 = vmatpush3.bf16.msra.mxu0 %v6184_v0  ;;  %5196 = vmatprep.mubr.msk.f32.mxu0 %vm1539_vm5, %v2475_v31  ;;  %v3093_v53 = vpop.permute.xlu1 %3092 }
 0x3c7   : > { %5418 = vmatprep.subr.bf16.mxu0 %v5417_v32 }
 0x3c9   : > { %5197 = vmatmul.mubr.msk.f32.gmra.mrb[24].mxu0 %vm1539_vm5, %v2476_v30  ;;  %v3010_v62 = vpop.permute.xlu0 %3009 }
 0x3ca   : > { %5420 = vmatpush3.bf16.msra.mxu0 %v5417_v32  ;;  %5207 = vmatprep.mubr.msk.f32.mxu0 %vm1913_vm6, %v6051_v17  ;;  %v2024_v22 = vpop.permute.xlu1 %2023 }
 0x3cb   : > { %5422 = vmatprep.subr.bf16.mxu0 %v6242_v51  ;;  %v5497_v14 = vadd.f32 %v6261_v21, %v2024_v22 }
 0x3cd   : > { %5208 = vmatmul.mubr.msk.f32.vlgmr.msra.gmra.mrb[26].mxu0 %vm1913_vm6, %v6054_v18  ;;  %v3095_v36 = vpop.permute.xlu0 %3094  ;;  %v4793_v27 = vmul.f32 -1.442695, %v5497_v14 }
 0x3ce   : > { %5424 = vmatpush3.bf16.msra.mxu0 %v6242_v51  ;;  %5218 = vmatprep.mubr.msk.f32.mxu0 %vm1913_vm6, %v2923_v48 }
 0x3d1   : > { %v2029_v42 = vpop.permute.xlu0 %2028 }
 0x3d2   : > { %v5496_v23 = vadd.f32 %v6259_v12, %v2029_v42 }
 0x3d4   : > { %v4794_v26 = vmul.f32 -1.442695, %v5496_v23 }
 0x3d5   : > { %v2918_v51 = vpop.permute.xlu0 %2917 }
 0x3d6   : > { %5606 = vpow2.f32 %v4794_v26 }
 0x3d7   : > { %5608 = vpow2.f32 %v4793_v27 }
 0x3d9   : > { %v6301_v3 = vpop.permute.xlu0 %3799 }
 0x3dd   : > { %v6306_v15 = vpop.permute.xlu0 %3702 }
 0x3e0   : > { %v5607_v30 = vpop.eup %5606 }
 0x3e1   : > { %v3889_v19 = vpop.permute.xlu0 %3888  ;;  %v5609_v31 = vpop.eup %5608  ;;  %v2470_v32 = vadd.f32 1.0, %v5607_v30 }
 0x3e2   : > { %v2469_v48 = vadd.f32 1.0, %v5609_v31 }
 0x3e3   : > { %5610 = vrcp.f32 %v2470_v32  ;;  %v4067_v32 = vstv %s4064_s19 }
 0x3e4   : > { %5612 = vrcp.f32 %v2469_v48 }
 0x3e5   : > { %v4055_v27 = vpop.permute.xlu0 %4054 }
 0x3ed   : > { %v5611_v21 = vpop.eup %5610 }
 0x484   : > { %v5168_v0 = vpop.f32.mrb[12].mxu0 }
 0x485   : > { %v2559_v34 = vpop.f32.mrb[13].mxu0 }
 0x486   : > { %v5425_v37 = vpack.c.bf16 %v5168_v0, %v2559_v34 }
 0x488   : > { %v5175_v38 = vpop.f32.mrb[14].mxu0  ;;  %5426 = vmatprep.subr.bf16.mxu0 %v5425_v37 }
 0x489   : > { %v2634_v40 = vpop.f32.mrb[15].mxu0  ;;  %5428 = vmatpush3.bf16.msra.mxu0 %v5425_v37  ;;  %v5613_v37 = vpop.eup %5612 }
 0x48a   : > { %v5429_v17 = vpack.c.bf16 %v5175_v38, %v2634_v40  ;;  %v3265_v38 = vsub.f32 1.0, %v5611_v21 }
 0x48c   : > { %v5178_v43 = vpop.f32.mrb[16].mxu0  ;;  %5219 = vmatmul.mubr.msk.f32.vlgmr.msra.gmra.mrb[26].mxu0 %vm1913_vm6, %v2925_v61  ;;  %5430 = vmatprep.subr.bf16.mxu0 %v5429_v17 }
 0x48d   : > { %v2644_v18 = vpop.f32.mrb[17].mxu0  ;;  %5432 = vmatpush3.bf16.msra.mxu0 %v5429_v17  ;;  %5229 = vmatprep.mubr.msk.f32.mxu0 %vm1913_vm6, %v3008_v41  ;;  %v3264_v41 = vsub.f32 1.0, %v5613_v37 }
 0x48e   : > { %v5433_v44 = vpack.c.bf16 %v5178_v43, %v2644_v18  ;;  %v3263_v43 = vmul.f32 %v5611_v21, %v6193_v2 }
 0x490   : > { %v5185_v46 = vpop.f32.mrb[18].mxu0  ;;  %5434 = vmatprep.subr.bf16.mxu0 %v5433_v44 }
 0x491   : > { %v2719_v47 = vpop.f32.mrb[19].mxu0  ;;  %5436 = vmatpush3.bf16.msra.mxu0 %v5433_v44  ;;  %v3262_v44 = vmul.f32 %v5613_v37, %v6176_v63  ;;  %v1250_v63 = vld [vmem:[%s6569_s26] sm:$0x3] }
 0x492   : > { %v5437_v52 = vpack.c.bf16 %v5185_v46, %v2719_v47  ;;  %vm3352_vm9 = vcmp.gt.f32.partialorder %v1250_v63, 0.0 }
 0x494   : > { %v5188_v56 = vpop.f32.mrb[20].mxu0  ;;  %5230 = vmatmul.mubr.msk.f32.vlgmr.msra.gmra.mrb[26].mxu0 %vm1913_vm6, %v3010_v62  ;;  %5438 = vmatprep.subr.bf16.mxu0 %v5437_v52  ;;  %v2913_v62 = vpop.permute.xlu1 %2912 }
 0x495   : > { %v2729_v58 = vpop.f32.mrb[21].mxu0  ;;  %5440 = vmatpush3.bf16.msra.mxu0 %v5437_v52  ;;  %5240 = vmatprep.mubr.msk.f32.mxu0 %vm1913_vm6, %v3093_v53  ;;  %v3272_v53 = vld [vmem:[%s6571_s8] sm:$0x3] }
 0x496   : > { %v5441_v60 = vpack.c.bf16 %v5188_v56, %v2729_v58 }
 0x498   : > { %v5195_v4 = vpop.f32.mrb[22].mxu0  ;;  %5442 = vmatprep.subr.bf16.mxu0 %v5441_v60  ;;  %v3277_v12 = vpop.permute.xlu1 %3276 }
 0x499   : > { %v2804_v6 = vpop.f32.mrb[23].mxu0  ;;  %5444 = vmatpush3.bf16.msra.mxu0 %v5441_v60 }
 0x49a   : > { %v5445_v7 = vpack.c.bf16 %v5195_v4, %v2804_v6 }
 0x49c   : > { %v5198_v9 = vpop.f32.mrb[24].mxu0  ;;  %5241 = vmatmul.mubr.msk.f32.vlgmr.msra.gmra.mrb[26].mxu0 %vm1913_vm6, %v3095_v36  ;;  %5446 = vmatprep.subr.bf16.mxu0 %v5445_v7  ;;  %v6316_v17 = vpop.permute.xlu1 %3801 }
 0x49d   : > { %v2814_v10 = vpop.f32.mrb[25].mxu0  ;;  %5448 = vmatpush3.bf16.msra.mxu0 %v5445_v7  ;;  %5251 = vmatprep.mubr.msk.f32.mxu0 %vm1913_vm6, %v2824_v8 }
 0x49e   : > { %v5449_v16 = vpack.c.bf16 %v5198_v9, %v2814_v10 }
 0x4a0   : > { %5450 = vmatprep.subr.bf16.mxu0 %v5449_v16  ;;  %v6327_v52 = vpop.permute.xlu1 %3707 }
 0x4a1   : > { %5452 = vmatpush3.bf16.msra.mxu0 %v5449_v16 }
 0x4a4   : > { %5252 = vmatmul.mubr.msk.f32.vlgmr.msra.gmra.mrb[26].mxu0 %vm1913_vm6, %v2826_v11  ;;  %v3891_v56 = vpop.permute.xlu1 %3890 }
 0x4a5   : > { %5317 = vmatprep.mubr.msk.f32.mxu0 %vm1539_vm5, %v3889_v19 }
 0x4a8   : > { %v4060_v31 = vpop.permute.xlu1 %4059 }
 0x577   : > { %v5253_v61 = vpop.f32.mrb[26].mxu0 }
 0x578   : > { %v5498_v0 = vadd.f32 %v5253_v61, %v2918_v51  ;;  %v3249_v34 = vpop.f32.mrb[27].mxu0 }
 0x579   : > { %v5499_v36 = vadd.f32 %v3249_v34, %v2913_v62 }
 0x57a   : > { %5614 = vtanh.f32 %v5498_v0 }
 0x57b   : > { %5616 = vtanh.f32 %v5499_v36 }
 0x584   : > { %v5615_v40 = vpop.eup %5614 }
 0x585   : > { %v5617_v42 = vpop.eup %5616  ;;  %v3267_v18 = vmul.f32 %v5615_v40, %v3265_v38  ;;  %v4224_v40 = vpop.permute.xlu1 %4223 }
 0x586   : > { %v3266_v46 = vmul.f32 %v5617_v42, %v3264_v41 }
 0x587   : > { %v6320_v47 = vadd.f32 %v3267_v18, %v3263_v43 }
 0x588   : > { %v3268_v51 = vadd.f32 %v3266_v46, %v3262_v44 }
 0x589   : > { %3271 = vst.msk [vmem:[#allocation2 + $0x8] sm:$0xff] %vm1539_vm5, %v6320_v47  ;;  %4234 = vst.msk [vmem:[%s5986_s25 + $0x18] sm:$0xff] %vm1539_vm5, %v6320_v47 }
 0x58a   : > { %3270 = vst.msk [vmem:[#allocation2] sm:$0xff] %vm1539_vm5, %v3268_v51  ;;  %4233 = vst.msk [vmem:[%s5986_s25 + $0x10] sm:$0xff] %vm1539_vm5, %v3268_v51  ;;  %v6333_v2 = vpack.c.bf16 %v6320_v47, %v3268_v51 }
 0x58c   : > { %5455 = vmatpush3.bf16.msra.mxu1 %v6333_v2  ;;  %5481 = vmatprep.subr.bf16.mxu0 %v6333_v2 }
 0x58d   : > { %5483 = vmatpush3.bf16.msra.mxu0 %v6333_v2  ;;  %5261 = vmatprep.subr.msk.mxu1 %vm1272_vm2, %v1250_v63 }
 0x58f   : > { %5259 = vmatmul.mubr.msk.f32.vlgmr.msra.gmra.mrb[14].mxu1 %vm1539_vm5, %v3272_v53 }
 0x590   : > { %5263 = vmatprep.mubr.msk.f32.mxu1 %vm1267_vm4, %v6102_v33  ;;  %5262 = vmatpush3.msk.msra.mxu1 %vm1272_vm2, %v1250_v63  ;;  %v1249_v33 = vld [vmem:[%s6573_s23] sm:$0x3] }
 0x591   : > { %5318 = vmatmul.mubr.msk.f32.vlgmr.msra.gmra.mrb[28].mxu0 %vm1539_vm5, %v3891_v56 }
 0x592   : > { %5324 = vmatprep.mubr.msk.f32.mxu0 %vm1539_vm5, %v6086_v28 }
 0x593   : > { %5264 = vmatmul.mubr.msk.f32.vlgmr.msra.gmra.mrb[16].mxu1 %vm1267_vm4, %v6107_v35 }
 0x594   : > { %5268 = vmatprep.mubr.msk.f32.mxu1 %vm1267_vm4, %v5990_v1 }
 0x662   : > { %v3348_v58 = vpop.f32.mrb[14].mxu1 }
 0x663   : > { %v3349_v60 = vadd.f32 %v3348_v58, %v3277_v12  ;;  %v5260_v4 = vpop.f32.mrb[15].mxu1 }
 0x665   : > { %4230 = vst.msk [vmem:[%s1228_s11] sm:$0x3] %vm4227_vm8, %v3349_v60  ;;  %v3353_v28 = vsel %vm3352_vm9, %v1249_v33, %v3349_v60 }
 0x666   : > { %5266 = vmatprep.subr.msk.mxu1 %vm1272_vm2, %v3353_v28 }
 0x667   : > { %5267 = vmatpush3.msk.msra.mxu1 %vm1272_vm2, %v3353_v28 }
 0x668   : > { %5269 = vmatmul.mubr.msk.f32.vlgmr.msra.gmra.mrb[16].mxu1 %vm1267_vm4, %v6001_v5  ;;  %5457 = vmatprep.subr.bf16.mxu1 %v6124_v39 }
 0x669   : > { %5459 = vmatpush3.bf16.msra.mxu1 %v6124_v39 }
 0x73b   : > { %v5270_v1 = vpop.f32.mrb[16].mxu1 }
 0x73c   : > { %v3511_v35 = vadd.f32 %v5270_v1, %v6152_v49  ;;  %v3501_v6 = vpop.f32.mrb[17].mxu1 }
 0x73d   : > { %v3510_v7 = vadd.f32 %v3501_v6, %v6154_v50 }
 0x73e   : > { %v3513_v8 = vadd.f32 %v3511_v35, %v6157_v54 }
 0x73f   : > { %v3512_v9 = vadd.f32 %v3510_v7, %v6163_v57 }
 0x740   : > { %v3515_v16 = vadd.f32 %v3513_v8, %v6160_v55 }
 0x741   : > { %v3514_v10 = vadd.f32 %v3512_v9, %v6167_v59 }
 0x743   : > { %5275 = vmatprep.mubr.msk.f32.mxu1 %vm1539_vm5, %v3514_v10 }
 0x744   : > { %5276 = vmatmul.mubr.msk.f32.vlgmr.msra.gmra.mrb[18].mxu1 %vm1539_vm5, %v3515_v16 }
 0x745   : > { %5278 = vmatprep.mubr.msk.f32.mxu1 %vm1539_vm5, %v3268_v51 }
 0x748   : > { %5279 = vmatmul.mubr.msk.f32.gmra.mrb[20].mxu1 %vm1539_vm5, %v6320_v47 }
 0x749   : > { %5289 = vmatprep.mubr.msk.f32.mxu1 %vm1913_vm6, %v6074_v24 }
 0x817   : > { %v5277_v5 = vpop.f32.mrb[18].mxu1 }
 0x818   : > { %v3600_v39 = vpop.f32.mrb[19].mxu1 }
 0x819   : > { %v5460_v49 = vpack.c.bf16 %v5277_v5, %v3600_v39 }
 0x81b   : > { %v5280_v50 = vpop.f32.mrb[20].mxu1  ;;  %5461 = vmatprep.subr.bf16.mxu1 %v5460_v49 }
 0x81c   : > { %v3610_v54 = vpop.f32.mrb[21].mxu1  ;;  %5463 = vmatpush3.bf16.msra.mxu1 %v5460_v49 }
 0x81d   : > { %v5464_v55 = vpack.c.bf16 %v5280_v50, %v3610_v54 }
 0x81f   : > { %5465 = vmatprep.subr.bf16.mxu1 %v5464_v55 }
 0x820   : > { %5467 = vmatpush3.bf16.msra.mxu1 %v5464_v55 }
 0x821   : > { %5469 = vmatprep.subr.bf16.mxu1 %v6140_v45 }
 0x823   : > { %5290 = vmatmul.mubr.msk.f32.vlgmr.msra.gmra.mrb[22].mxu1 %vm1913_vm6, %v6079_v25 }
 0x824   : > { %5471 = vmatpush3.bf16.msra.mxu1 %v6140_v45  ;;  %5296 = vmatprep.mubr.msk.f32.mxu1 %vm1539_vm5, %v3514_v10 }
 0x827   : > { %5297 = vmatmul.mubr.msk.f32.vlgmr.msra.gmra.mrb[24].mxu1 %vm1539_vm5, %v3515_v16 }
 0x828   : > { %5299 = vmatprep.mubr.msk.f32.mxu1 %vm1539_vm5, %v3268_v51 }
 0x82b   : > { %5300 = vmatmul.mubr.msk.f32.gmra.mrb[26].mxu1 %vm1539_vm5, %v6320_v47 }
 0x82c   : > { %5310 = vmatprep.mubr.msk.f32.mxu1 %vm1913_vm6, %v6301_v3  ;;  %v4072_v3 = vld [vmem:[%s1208_s7] sm:$0x3] }
 0x82d   : > { %4074 = vrot.lane.b32.xlu0 %v4072_v3, %s5685_s29 }
 0x89f   : > { %v4075_v30 = vpop.permute.xlu0 %4074 }
 0x8fa   : > { %v5298_v24 = vpop.f32.mrb[24].mxu1 }
 0x8fb   : > { %v3780_v57 = vpop.f32.mrb[25].mxu1 }
 0x8fc   : > { %v5472_v59 = vpack.c.bf16 %v5298_v24, %v3780_v57 }
 0x8fe   : > { %v5301_v11 = vpop.f32.mrb[26].mxu1  ;;  %5473 = vmatprep.subr.bf16.mxu1 %v5472_v59 }
 0x8ff   : > { %v3790_v25 = vpop.f32.mrb[27].mxu1  ;;  %5475 = vmatpush3.bf16.msra.mxu1 %v5472_v59 }
 0x900   : > { %v5476_v45 = vpack.c.bf16 %v5301_v11, %v3790_v25 }
 0x902   : > { %5477 = vmatprep.subr.bf16.mxu1 %v5476_v45 }
 0x903   : > { %5479 = vmatpush3.bf16.msra.mxu1 %v5476_v45 }
 0x904   : > { %5488 = vmatprep.subr.bf16.mxu1 %v5686_v20 }
 0x906   : > { %5311 = vmatmul.mubr.msk.f32.vlgmr.msra.gmra.mrb[22].mxu1 %vm1913_vm6, %v6316_v17 }
 0x907   : > { %5490 = vmatpush3.bf16.msra.mxu1 %v6333_v2  ;;  %5331 = vmatprep.mubr.msk.f32.mxu1 %vm5687_vm7, %v5688_v13 }
 0x90a   : > { %5332 = vmatmul.mubr.msk.f32.vlgmr.msra.gmra.mrb[28].mxu1 %vm1539_vm5, %v4075_v30 }
 0x9d9   : > { %v5312_v19 = vpop.f32.mrb[22].mxu1 }
 0x9da   : > { %v5500_v22 = vadd.f32 %v5312_v19, %v6327_v52  ;;  %v3873_v23 = vpop.f32.mrb[23].mxu1 }
 0x9db   : > { %v5501_v14 = vadd.f32 %v3873_v23, %v6306_v15 }
 0x9dd   : > { %v5484_v26 = vpack.c.bf16 %v5500_v22, %v5501_v14  ;;  %v4144_v36 = vpop.f32.mrb[28].mxu1 }
 0x9de   : > { %v5333_v12 = vpop.f32.mrb[29].mxu1 }
 0x9df   : > { %5485 = vmatprep.subr.bf16.mxu0 %v5484_v26 }
 0x9e0   : > { %5487 = vmatpush3.bf16.msra.mxu0 %v5484_v26 }
 0x9e1   : > { %5491 = vmatprep.subr.bf16.mxu0 %v5686_v20 }
 0x9e3   : > { %5325 = vmatmul.mubr.msk.f32.vlgmr.msra.gmra.mrb[28].mxu0 %vm1539_vm5, %v6091_v29 }
 0x9e4   : > { %5338 = vmatprep.mubr.msk.f32.mxu0 %vm5687_vm7, %v5688_v13 }
 0xab6   : > { %v5326_v15 = vpop.f32.mrb[28].mxu0 }
 0xab7   : > { %v4063_v48 = vadd.f32 %v5326_v15, %v4060_v31  ;;  %v4041_v61 = vpop.f32.mrb[29].mxu0 }
 0xab8   : > { %v4062_v62 = vadd.f32 %v4055_v27, %v4041_v61 }
 0xab9   : > { %vm4066_vm10 = vcmp.ge.f32.partialorder %v4063_v48, 0.0  ;;  %v4069_v20 = vmul.f32 %v4067_v32, %v4063_v48 }
 0xaba   : > { %vm4065_vm11 = vcmp.ge.f32.partialorder %v4062_v62, 0.0  ;;  %v4068_v29 = vmul.f32 %v4067_v32, %v4062_v62 }
 0xabb   : > { %v4071_v0 = vsel %vm4066_vm10, %v4063_v48, %v4069_v20 }
 0xabc   : > { %4232 = vst.msk [vmem:[%s5986_s25 + $0x8] sm:$0xff] %vm1539_vm5, %v4071_v0  ;;  %v4070_v13 = vsel %vm4065_vm11, %v4062_v62, %v4068_v29 }
 0xabd   : > { %v5492_v34 = vpack.c.bf16 %v4071_v0, %v4070_v13  ;;  %4231 = vst.msk [vmem:[%s5986_s25] sm:$0xff] %vm1539_vm5, %v4070_v13 }
 0xabf   : > { %5493 = vmatpush3.bf16.msra.mxu0 %v5492_v34 }
 0xac2   : > { %5339 = vmatmul.mubr.msk.f32.vlgmr.msra.gmra.mrb[30].mxu0 %vm1539_vm5, %v4072_v3 }
 0xb95   : > { %v4216_v21 = vpop.f32.mrb[30].mxu0 }
 0xb96   : > { %v4217_v37 = vadd.f32 %v4216_v21, %v4144_v36  ;;  %v5340_v38 = vpop.f32.mrb[31].mxu0 }
 0xb98   : > { %v4226_v17 = vadd.f32 %v4224_v40, %v4217_v37 }
 0xb9a   : > { %4228 = vst.msk [vmem:[#allocation3] sm:$0x3] %vm4227_vm8, %v4226_v17  ;;  %4229 = vst.msk [vmem:[%s1220_s9] sm:$0x3] %vm4227_vm8, %v4226_v17 }
 0xb9b PF: > { %s6578_s25 = sld [smem:[#allocation11_spill]]  ;;  %s6579_s5 = sld [smem:[#allocation9_spill]] }
 0xb9c   : > { %s6580_s26 = sld [smem:[#allocation10_spill]]  ;;  %s6581_s27 = sld [smem:[#allocation12_spill]] }
 0xb9d   : > { %s6582_s28 = sld [smem:[#allocation13_spill]] }
 0xba1   : > { %s36_s6 = sadd.s32 1, %s6578_s25  }
 0xba2   : > { %p33_p5 = scmp.ge.s32.totalorder %s36_s6, 10  }
 0xba4   :  { %35 = sbr.rel (!%p33_p5) target bundleno = 29 (0x1d), region = 231 }
 0xbab   :  { %4308 = vsyncpa [#allocation5], 1 }
 0xbac   :  { %4310 = vsyncpa [#allocation5 + $0x1], 1 }

</bundles_post_ra>
